<compile_context>
chip_gen: v5e
topology: v5e:2x2
jax: 0.10.0
libtpu: 0.0.40
codegen_flags: <defaults>
</compile_context>

<pallas_src>
import functools

import jax
import jax.numpy as jnp
from jax import lax
from jax.experimental import pallas as pl
from jax.experimental.pallas import tpu as pltpu

BN_EPS = 1e-5


# ---------------------------------------------------------------------------
# Per-generation budgets & tile selection
# ---------------------------------------------------------------------------
def _chip_budgets():
    """Return (vmem_limit_bytes, hard tile cap) for the current TPU generation."""
    try:
        vmem_cap = pltpu.get_tpu_info().vmem_capacity_bytes
    except Exception:
        vmem_cap = 64 * 1024 * 1024                 # conservative fallback (v7x-sized)
    if vmem_cap >= 128 * 1024 * 1024:               # v5e / v6e: 128 MiB physical VMEM
        return 64 * 1024 * 1024, 8192
    return 32 * 1024 * 1024, 4096                   # v7x: 64 MiB physical VMEM


def _pick_tile_n(n, d, c1, c2, out_itemsize, vmem_limit, hard_cap):
    """Largest multiple-of-128 tile that keeps the double-buffered working set in budget."""
    if n <= 128:
        return n    # single full-extent tile; sub-128-lane stores unavoidable at tiny N
    # bytes per token: dbl-buffered inputs (3 f32 ch) + dbl-buffered output + temporaries
    per_tok = 24 + 2 * d * out_itemsize + 8 * (c1 + c2 + d)
    cap = min(hard_cap, max(128, int(vmem_limit * 0.55) // per_tok))
    cap -= cap % 128
    cap = max(cap, 128)
    return min(cap, (n // 128) * 128)


# ---------------------------------------------------------------------------
# Shared kernel helpers
# ---------------------------------------------------------------------------
def _layer1_vpu(kpts, score, w1):
    """Layer 1 [C1,3]@[3,T] as three VPU broadcast FMAs (no K=3 MXU pass)."""
    return (w1[:, 0:1] * kpts[0:1, :]
            + w1[:, 1:2] * kpts[1:2, :]
            + w1[:, 2:3] * score)


def _pack_scale_shift(a, c):
    """Pack [C,1] scale and [C,1] shift into a [C,2] slab (col 0 = scale, col 1 = shift)."""
    lane = lax.broadcasted_iota(jnp.int32, (a.shape[0], 2), 1)
    return jnp.where(lane == 0, a, c)


# ---------------------------------------------------------------------------
# Pass 1: global BatchNorm statistics -> folded per-channel (scale, shift)
# ---------------------------------------------------------------------------
def _stats_kernel(kpts_ref, sc_ref, w1_ref, gb1_ref, w2_ref, gb2_ref,   # inputs
                  ab1_ref, ab2_ref,                                     # outputs
                  s1, q1, s2, q2, ab1_s,                                # scratch
                  *, inv_m, n_valid, tile_n):
    p = pl.program_id(0)            # phase: 0 = layer-1 stats, 1 = layer-2 stats
    b = pl.program_id(1)
    t = pl.program_id(2)
    is_first = jnp.logical_and(b == 0, t == 0)
    is_last = jnp.logical_and(b == pl.num_programs(1) - 1,
                              t == pl.num_programs(2) - 1)

    # Valid-token mask (handles the partial trailing tile when tile_n does not
    # divide N).  jnp.where is a bitwise select -> NaN-safe against stale OOB reads.
    tok = t * tile_n + lax.broadcasted_iota(jnp.int32, (1, tile_n), 1)
    valid = tok < n_valid

    h1 = _layer1_vpu(kpts_ref[0], sc_ref[0], w1_ref[...])               # [C1, T] f32
    h1 = jnp.where(valid, h1, 0.0)

    @pl.when(jnp.logical_and(p == 0, is_first))
    def _():
        s1[...] = jnp.zeros_like(s1)
        q1[...] = jnp.zeros_like(q1)

    @pl.when(p == 0)
    def _():
        s1[...] += jnp.sum(h1, axis=1, keepdims=True)                   # XLU reduce
        q1[...] += jnp.sum(h1 * h1, axis=1, keepdims=True)

    @pl.when(jnp.logical_and(p == 1, is_first))
    def _():
        # TODO(synk): E[x^2]-E[x]^2 in f32 can cancel if inputs are not O(1);
        #             switch to a Welford-style merge if raw pixel coords are fed in.
        mu1 = s1[...] * inv_m
        var1 = q1[...] * inv_m - mu1 * mu1                              # biased (train BN)
        a1 = gb1_ref[:, 0:1] * lax.rsqrt(var1 + BN_EPS)                 # gamma * rsqrt
        c1 = gb1_ref[:, 1:2] - mu1 * a1                                 # beta - mu*scale
        ab1_s[...] = _pack_scale_shift(a1, c1)
        s2[...] = jnp.zeros_like(s2)
        q2[...] = jnp.zeros_like(q2)

    @pl.when(p == 1)
    def _():
        h1n = jnp.maximum(h1 * ab1_s[:, 0:1] + ab1_s[:, 1:2], 0.0)
        h2 = jnp.dot(w2_ref[...], h1n.astype(jnp.bfloat16),             # MXU bf16xbf16
                     preferred_element_type=jnp.float32)
        h2 = jnp.where(valid, h2, 0.0)
        s2[...] += jnp.sum(h2, axis=1, keepdims=True)
        q2[...] += jnp.sum(h2 * h2, axis=1, keepdims=True)

    @pl.when(jnp.logical_and(p == 1, is_last))
    def _():
        mu2 = s2[...] * inv_m
        var2 = q2[...] * inv_m - mu2 * mu2
        a2 = gb2_ref[:, 0:1] * lax.rsqrt(var2 + BN_EPS)
        c2 = gb2_ref[:, 1:2] - mu2 * a2
        ab1_ref[...] = ab1_s[...]
        ab2_ref[...] = _pack_scale_shift(a2, c2)


# ---------------------------------------------------------------------------
# Pass 2: fused MLP apply with folded BN; fully parallel over (batch, N-tiles)
# ---------------------------------------------------------------------------
def _apply_kernel(kpts_ref, sc_ref, w1_ref, ab1_ref, w2_ref, ab2_ref,
                  w3_ref, b3_ref, o_ref):
    h1 = _layer1_vpu(kpts_ref[0], sc_ref[0], w1_ref[...])               # [C1, T] (VPU)
    h1 = jnp.maximum(h1 * ab1_ref[:, 0:1] + ab1_ref[:, 1:2], 0.0)       # BN1 + ReLU
    h2 = jnp.dot(w2_ref[...], h1.astype(jnp.bfloat16),                  # [C2, T] (MXU)
                 preferred_element_type=jnp.float32)
    h2 = jnp.maximum(h2 * ab2_ref[:, 0:1] + ab2_ref[:, 1:2], 0.0)       # BN2 + ReLU
    out = jnp.dot(w3_ref[...], h2.astype(jnp.bfloat16),                 # [D, T]  (MXU)
                  preferred_element_type=jnp.float32) + b3_ref[...]
    o_ref[0] = out.astype(o_ref.dtype)                                  # lane-dense store


def _const_spec(shape, grid_ndim):
    zeros = (0,) * len(shape)
    if grid_ndim == 2:
        return pl.BlockSpec(shape, lambda b, t: zeros)
    return pl.BlockSpec(shape, lambda p, b, t: zeros)


# ---------------------------------------------------------------------------
# Wrapper
# ---------------------------------------------------------------------------
def keypoint_encoder(kpts, scores, params, *, out_dtype=jnp.float32, max_tile_n=None):
    """kpts: [B, N, 2], scores: [B, N] -> [B, feature_dim, N] (PyTorch layout)."""
    B, N, _ = kpts.shape
    # Only materializing wrapper op: channel-major keypoints.  The concat with
    # scores is fused into the kernels (scores stream separately).
    kpts_t = jnp.swapaxes(kpts, 1, 2).astype(jnp.float32)               # [B, 2, N]
    scores_r = scores[:, None, :].astype(jnp.float32)                   # [B, 1, N]

    w1, gb1 = params["w1"].astype(jnp.float32), params["gb1"].astype(jnp.float32)
    w2, gb2 = params["w2"], params["gb2"].astype(jnp.float32)
    w3, b3 = params["w3"], params["b3"].astype(jnp.float32)
    C1, C2, D = w1.shape[0], w2.shape[0], w3.shape[0]
    w2_bf = w2.astype(jnp.bfloat16)          # MXU operands in bf16 (f32 accumulation)
    w3_bf = w3.astype(jnp.bfloat16)

    vmem_limit, hard_cap = _chip_budgets()
    out_isz = jnp.dtype(out_dtype).itemsize
    tile_n = _pick_tile_n(N, D, C1, C2, out_isz, vmem_limit, hard_cap)
    if max_tile_n is not None:
        tile_n = max(1, min(tile_n, max_tile_n))
    T = pl.cdiv(N, tile_n)
    inv_m = 1.0 / float(B * N)

    # ---- pass 1: global BN statistics (sequential reduction grid) ----
    ab1, ab2 = pl.pallas_call(
        functools.partial(_stats_kernel, inv_m=inv_m, n_valid=N, tile_n=tile_n),
        out_shape=(jax.ShapeDtypeStruct((C1, 2), jnp.float32),
                   jax.ShapeDtypeStruct((C2, 2), jnp.float32)),
        grid_spec=pltpu.PrefetchScalarGridSpec(
            num_scalar_prefetch=0,
            grid=(2, B, T),
            in_specs=[pl.BlockSpec((1, 2, tile_n), lambda p, b, t: (b, 0, t)),
                      pl.BlockSpec((1, 1, tile_n), lambda p, b, t: (b, 0, t)),
                      _const_spec((C1, 3), 3), _const_spec((C1, 2), 3),
                      _const_spec((C2, C1), 3), _const_spec((C2, 2), 3)],
            out_specs=[_const_spec((C1, 2), 3), _const_spec((C2, 2), 3)],
            scratch_shapes=[pltpu.VMEM((C1, 1), jnp.float32),
                            pltpu.VMEM((C1, 1), jnp.float32),
                            pltpu.VMEM((C2, 1), jnp.float32),
                            pltpu.VMEM((C2, 1), jnp.float32),
                            pltpu.VMEM((C1, 2), jnp.float32)]),
        compiler_params=pltpu.CompilerParams(
            dimension_semantics=("arbitrary", "arbitrary", "arbitrary"),
            vmem_limit_bytes=vmem_limit),
    )(kpts_t, scores_r, w1, gb1, w2_bf, gb2)

    # ---- pass 2: apply MLP; output written directly as [B, D, N] (no transpose) ----
    out = pl.pallas_call(
        _apply_kernel,
        out_shape=jax.ShapeDtypeStruct((B, D, N), out_dtype),
        grid_spec=pltpu.PrefetchScalarGridSpec(
            num_scalar_prefetch=0,
            grid=(B, T),
            in_specs=[pl.BlockSpec((1, 2, tile_n), lambda b, t: (b, 0, t)),
                      pl.BlockSpec((1, 1, tile_n), lambda b, t: (b, 0, t)),
                      _const_spec((C1, 3), 2), _const_spec((C1, 2), 2),
                      _const_spec((C2, C1), 2), _const_spec((C2, 2), 2),
                      _const_spec((D, C2), 2), _const_spec((D, 1), 2)],
            out_specs=pl.BlockSpec((1, D, tile_n), lambda b, t: (b, 0, t))),
        compiler_params=pltpu.CompilerParams(
            dimension_semantics=("parallel", "parallel"),    # megacore-shardable
            vmem_limit_bytes=vmem_limit),
    )(kpts_t, scores_r, w1, ab1, w2_bf, ab2, w3_bf, b3)
    return out


# ---------------------------------------------------------------------------
# Parameter init + pure-JAX reference (validates the b1/b2-cancellation claim)
# ---------------------------------------------------------------------------
def init_params(key, layers, feature_dim):
    chans = [3] + list(layers) + [feature_dim]
    keys = jax.random.split(key, 4 * len(chans))
    p = {}
    for i in range(1, len(chans)):
        cin, cout = chans[i - 1], chans[i]
        k_w, k_b, k_g, k_be = keys[4 * (i - 1):4 * (i - 1) + 4]
        p[f"w{i}"] = jax.random.normal(k_w, (cout, cin), jnp.float32) / jnp.sqrt(cin)
        if i == len(chans) - 1:
            p[f"b{i}"] = jnp.zeros((cout, 1), jnp.float32)   # nn.init.constant_(last.bias, 0)
        else:
            # pre-BN conv bias: only the reference uses it (cancelled by BN mean subtraction)
            p[f"b{i}"] = 0.1 * jax.random.normal(k_b, (cout, 1), jnp.float32)
            gamma = 1.0 + 0.1 * jax.random.normal(k_g, (cout, 1), jnp.float32)
            beta = 0.1 * jax.random.normal(k_be, (cout, 1), jnp.float32)
            p[f"gb{i}"] = jnp.concatenate([gamma, beta], axis=1)   # [C, 2]
    return p


def _bn_relu_ref(h, gb):
    mu = jnp.mean(h, axis=(0, 2), keepdims=True)
    var = jnp.mean(jnp.square(h - mu), axis=(0, 2), keepdims=True)   # biased, train-mode
    h = (h - mu) * lax.rsqrt(var + BN_EPS)
    h = h * gb[None, :, 0:1] + gb[None, :, 1:2]
    return jnp.maximum(h, 0.0)


def reference_forward(kpts, scores, params):
    hp = lax.Precision.HIGHEST
    x = jnp.concatenate([jnp.swapaxes(kpts, 1, 2), scores[:, None, :]], axis=1)
    h = jnp.einsum("oc,bcn->bon", params["w1"], x, precision=hp) + params["b1"][None]
    h = _bn_relu_ref(h, params["gb1"])
    h = jnp.einsum("oc,bcn->bon", params["w2"], h, precision=hp) + params["b2"][None]
    h = _bn_relu_ref(h, params["gb2"])
    return jnp.einsum("oc,bcn->bon", params["w3"], h, precision=hp) + params["b3"][None]


if __name__ == "__main__":
    feature_dim = 32
    layers = [32, 64]

    key = jax.random.PRNGKey(0)
    k_a, k_b, k_c, k_d, k_p = jax.random.split(key, 5)
    params = init_params(k_p, layers, feature_dim)

    # bf16 MXU operands -> compare at ~1% tolerance against an f32-HIGHEST reference.
    ATOL = RTOL = 3e-2

    # Test 1: tiny N (single sub-128-lane tile), B=2.
    B1, N1 = 2, 8
    kpts1 = jax.random.normal(k_a, (B1, N1, 2), jnp.float32)
    scores1 = jax.random.uniform(k_b, (B1, N1), jnp.float32)
    run1 = jax.jit(lambda k, s: keypoint_encoder(k, s, params))
    out1 = jax.block_until_ready(run1(kpts1, scores1))
    assert out1.shape == (B1, feature_dim, N1), out1.shape
    ref1 = reference_forward(kpts1, scores1, params)
    err1 = float(jnp.max(jnp.abs(out1 - ref1)))
    assert jnp.allclose(out1, ref1, atol=ATOL, rtol=RTOL), err1

    # Test 2: multi-batch, multi-tile, N not a multiple of 128 (exercises the
    # is_first/is_last accumulation, phase transition, and trailing-tile masking).
    B2, N2 = 3, 300
    kpts2 = jax.random.normal(k_c, (B2, N2, 2), jnp.float32)
    scores2 = jax.random.uniform(k_d, (B2, N2), jnp.float32)
    run2 = jax.jit(lambda k, s: keypoint_encoder(k, s, params, max_tile_n=128))
    out2 = jax.block_until_ready(run2(kpts2, scores2))
    assert out2.shape == (B2, feature_dim, N2), out2.shape
    ref2 = reference_forward(kpts2, scores2, params)
    err2 = float(jnp.max(jnp.abs(out2 - ref2)))
    assert jnp.allclose(out2, ref2, atol=ATOL, rtol=RTOL), err2

    print("KERNEL_OK")
</pallas_src>

<mosaic_0001>
module attributes {stable_mosaic.version = 11 : i64} {
  func.func @_apply_kernel(%arg0: i32, %arg1: i32, %arg2: memref<1x2x8xf32, #tpu.memory_space<vmem>>, %arg3: memref<1x1x8xf32, #tpu.memory_space<vmem>>, %arg4: memref<32x3xf32, #tpu.memory_space<vmem>>, %arg5: memref<32x2xf32, #tpu.memory_space<vmem>>, %arg6: memref<64x32xbf16, #tpu.memory_space<vmem>>, %arg7: memref<64x2xf32, #tpu.memory_space<vmem>>, %arg8: memref<32x64xbf16, #tpu.memory_space<vmem>>, %arg9: memref<32x1xf32, #tpu.memory_space<vmem>>, %arg10: memref<1x32x8xf32, #tpu.memory_space<vmem>>) attributes {dimension_semantics = [#tpu.dimension_semantics<parallel>, #tpu.dimension_semantics<parallel>], iteration_bounds = array<i64: 2, 1>, scalar_prefetch = 0 : i64, scratch_operands = 0 : i64, tpu.core_type = #tpu.core_type<tc>, window_params = [{transform_indices = @transform_0, window_bounds = array<i64: 1, 2, 8>}, {transform_indices = @transform_1, window_bounds = array<i64: 1, 1, 8>}, {pipeline_mode = #tpu.pipeline_mode<synchronous>, transform_indices = @transform_2, window_bounds = array<i64: 32, 3>}, {pipeline_mode = #tpu.pipeline_mode<synchronous>, transform_indices = @transform_3, window_bounds = array<i64: 32, 2>}, {pipeline_mode = #tpu.pipeline_mode<synchronous>, transform_indices = @transform_4, window_bounds = array<i64: 64, 32>}, {pipeline_mode = #tpu.pipeline_mode<synchronous>, transform_indices = @transform_5, window_bounds = array<i64: 64, 2>}, {pipeline_mode = #tpu.pipeline_mode<synchronous>, transform_indices = @transform_6, window_bounds = array<i64: 32, 64>}, {pipeline_mode = #tpu.pipeline_mode<synchronous>, transform_indices = @transform_7, window_bounds = array<i64: 32, 1>}, {transform_indices = @transform_8, window_bounds = array<i64: 1, 32, 8>}]} {
    %c0 = arith.constant 0 : index
    %c0_0 = arith.constant 0 : index
    %c0_1 = arith.constant 0 : index
    %0 = vector.load %arg2[%c0, %c0_0, %c0_1] : memref<1x2x8xf32, #tpu.memory_space<vmem>>, vector<1x2x8xf32>
    %1 = vector.shape_cast %0 : vector<1x2x8xf32> to vector<2x8xf32>
    %c0_2 = arith.constant 0 : index
    %c0_3 = arith.constant 0 : index
    %c0_4 = arith.constant 0 : index
    %2 = vector.load %arg3[%c0_2, %c0_3, %c0_4] : memref<1x1x8xf32, #tpu.memory_space<vmem>>, vector<1x1x8xf32>
    %3 = vector.shape_cast %2 : vector<1x1x8xf32> to vector<1x8xf32>
    %c0_5 = arith.constant 0 : index
    %c0_6 = arith.constant 0 : index
    %4 = vector.load %arg4[%c0_5, %c0_6] : memref<32x3xf32, #tpu.memory_space<vmem>>, vector<32x3xf32>
    %5 = vector.extract_strided_slice %4 {offsets = [0, 0], sizes = [32, 1], strides = [1, 1]} : vector<32x3xf32> to vector<32x1xf32>
    %6 = vector.extract_strided_slice %1 {offsets = [0, 0], sizes = [1, 8], strides = [1, 1]} : vector<2x8xf32> to vector<1x8xf32>
    %7 = vector.broadcast %5 : vector<32x1xf32> to vector<32x8xf32>
    %8 = vector.broadcast %6 : vector<1x8xf32> to vector<32x8xf32>
    %9 = arith.mulf %7, %8 : vector<32x8xf32>
    %10 = vector.extract_strided_slice %4 {offsets = [0, 1], sizes = [32, 1], strides = [1, 1]} : vector<32x3xf32> to vector<32x1xf32>
    %11 = vector.extract_strided_slice %1 {offsets = [1, 0], sizes = [1, 8], strides = [1, 1]} : vector<2x8xf32> to vector<1x8xf32>
    %12 = vector.broadcast %10 : vector<32x1xf32> to vector<32x8xf32>
    %13 = vector.broadcast %11 : vector<1x8xf32> to vector<32x8xf32>
    %14 = arith.mulf %12, %13 : vector<32x8xf32>
    %15 = arith.addf %9, %14 : vector<32x8xf32>
    %16 = vector.extract_strided_slice %4 {offsets = [0, 2], sizes = [32, 1], strides = [1, 1]} : vector<32x3xf32> to vector<32x1xf32>
    %17 = vector.broadcast %16 : vector<32x1xf32> to vector<32x8xf32>
    %18 = vector.broadcast %3 : vector<1x8xf32> to vector<32x8xf32>
    %19 = arith.mulf %17, %18 : vector<32x8xf32>
    %20 = arith.addf %15, %19 : vector<32x8xf32>
    %c0_7 = arith.constant 0 : index
    %c0_8 = arith.constant 0 : index
    %21 = vector.load %arg5[%c0_7, %c0_8] : memref<32x2xf32, #tpu.memory_space<vmem>>, vector<32x1xf32>
    %22 = vector.broadcast %21 : vector<32x1xf32> to vector<32x8xf32>
    %23 = arith.mulf %20, %22 : vector<32x8xf32>
    %c0_9 = arith.constant 0 : index
    %c1 = arith.constant 1 : index
    %24 = vector.load %arg5[%c0_9, %c1] : memref<32x2xf32, #tpu.memory_space<vmem>>, vector<32x1xf32>
    %25 = vector.broadcast %24 : vector<32x1xf32> to vector<32x8xf32>
    %26 = arith.addf %23, %25 : vector<32x8xf32>
    %cst = arith.constant 0.000000e+00 : f32
    %27 = vector.broadcast %cst : f32 to vector<32x8xf32>
    %28 = arith.maximumf %26, %27 : vector<32x8xf32>
    %c0_10 = arith.constant 0 : index
    %c0_11 = arith.constant 0 : index
    %29 = vector.load %arg6[%c0_10, %c0_11] : memref<64x32xbf16, #tpu.memory_space<vmem>>, vector<64x32xbf16>
    %30 = arith.truncf %28 : vector<32x8xf32> to vector<32x8xbf16>
    %cst_12 = arith.constant dense<0.000000e+00> : vector<64x8xf32>
    %31 = tpu.matmul %29, %30, %cst_12 {dimension_numbers = #tpu.dot_dimension_numbers<[1], [0], [0], [1], [0, 0, 1, 1], [], []>} : vector<64x32xbf16>, vector<32x8xbf16>, vector<64x8xf32> -> vector<64x8xf32>
    %c0_13 = arith.constant 0 : index
    %c0_14 = arith.constant 0 : index
    %32 = vector.load %arg7[%c0_13, %c0_14] : memref<64x2xf32, #tpu.memory_space<vmem>>, vector<64x1xf32>
    %33 = vector.broadcast %32 : vector<64x1xf32> to vector<64x8xf32>
    %34 = arith.mulf %31, %33 : vector<64x8xf32>
    %c0_15 = arith.constant 0 : index
    %c1_16 = arith.constant 1 : index
    %35 = vector.load %arg7[%c0_15, %c1_16] : memref<64x2xf32, #tpu.memory_space<vmem>>, vector<64x1xf32>
    %36 = vector.broadcast %35 : vector<64x1xf32> to vector<64x8xf32>
    %37 = arith.addf %34, %36 : vector<64x8xf32>
    %cst_17 = arith.constant 0.000000e+00 : f32
    %38 = vector.broadcast %cst_17 : f32 to vector<64x8xf32>
    %39 = arith.maximumf %37, %38 : vector<64x8xf32>
    %c0_18 = arith.constant 0 : index
    %c0_19 = arith.constant 0 : index
    %40 = vector.load %arg8[%c0_18, %c0_19] : memref<32x64xbf16, #tpu.memory_space<vmem>>, vector<32x64xbf16>
    %41 = arith.truncf %39 : vector<64x8xf32> to vector<64x8xbf16>
    %cst_20 = arith.constant dense<0.000000e+00> : vector<32x8xf32>
    %42 = tpu.matmul %40, %41, %cst_20 {dimension_numbers = #tpu.dot_dimension_numbers<[1], [0], [0], [1], [0, 0, 1, 1], [], []>} : vector<32x64xbf16>, vector<64x8xbf16>, vector<32x8xf32> -> vector<32x8xf32>
    %c0_21 = arith.constant 0 : index
    %c0_22 = arith.constant 0 : index
    %43 = vector.load %arg9[%c0_21, %c0_22] : memref<32x1xf32, #tpu.memory_space<vmem>>, vector<32x1xf32>
    %44 = vector.broadcast %43 : vector<32x1xf32> to vector<32x8xf32>
    %45 = arith.addf %42, %44 : vector<32x8xf32>
    %c0_23 = arith.constant 0 : index
    %c0_24 = arith.constant 0 : index
    %c0_25 = arith.constant 0 : index
    %46 = vector.load %arg10[%c0_23, %c0_24, %c0_25] : memref<1x32x8xf32, #tpu.memory_space<vmem>>, vector<1x32x8xf32>
    %47 = vector.shape_cast %46 : vector<1x32x8xf32> to vector<32x8xf32>
    %48 = vector.shape_cast %45 : vector<32x8xf32> to vector<1x32x8xf32>
    tpu.vector_store %arg10[%c0_23, %c0_24, %c0_25], %48 {strides = array<i32>} : memref<1x32x8xf32, #tpu.memory_space<vmem>>, vector<1x32x8xf32>,
    return
  }
  func.func @transform_0(%arg0: i32, %arg1: i32) -> (i32, i32, i32) {
    %c0_i32 = arith.constant 0 : i32
    %c0_i32_0 = arith.constant 0 : i32
    return %arg0, %c0_i32, %arg1 : i32, i32, i32
  }
  func.func @transform_1(%arg0: i32, %arg1: i32) -> (i32, i32, i32) {
    %c0_i32 = arith.constant 0 : i32
    %c0_i32_0 = arith.constant 0 : i32
    return %arg0, %c0_i32, %arg1 : i32, i32, i32
  }
  func.func @transform_2(%arg0: i32, %arg1: i32) -> (i32, i32) {
    %c0_i32 = arith.constant 0 : i32
    %c0_i32_0 = arith.constant 0 : i32
    %c0_i32_1 = arith.constant 0 : i32
    return %c0_i32, %c0_i32_0 : i32, i32
  }
  func.func @transform_3(%arg0: i32, %arg1: i32) -> (i32, i32) {
    %c0_i32 = arith.constant 0 : i32
    %c0_i32_0 = arith.constant 0 : i32
    %c0_i32_1 = arith.constant 0 : i32
    return %c0_i32, %c0_i32_0 : i32, i32
  }
  func.func @transform_4(%arg0: i32, %arg1: i32) -> (i32, i32) {
    %c0_i32 = arith.constant 0 : i32
    %c0_i32_0 = arith.constant 0 : i32
    %c0_i32_1 = arith.constant 0 : i32
    return %c0_i32, %c0_i32_0 : i32, i32
  }
  func.func @transform_5(%arg0: i32, %arg1: i32) -> (i32, i32) {
    %c0_i32 = arith.constant 0 : i32
    %c0_i32_0 = arith.constant 0 : i32
    %c0_i32_1 = arith.constant 0 : i32
    return %c0_i32, %c0_i32_0 : i32, i32
  }
  func.func @transform_6(%arg0: i32, %arg1: i32) -> (i32, i32) {
    %c0_i32 = arith.constant 0 : i32
    %c0_i32_0 = arith.constant 0 : i32
    %c0_i32_1 = arith.constant 0 : i32
    return %c0_i32, %c0_i32_0 : i32, i32
  }
  func.func @transform_7(%arg0: i32, %arg1: i32) -> (i32, i32) {
    %c0_i32 = arith.constant 0 : i32
    %c0_i32_0 = arith.constant 0 : i32
    %c0_i32_1 = arith.constant 0 : i32
    return %c0_i32, %c0_i32_0 : i32, i32
  }
  func.func @transform_8(%arg0: i32, %arg1: i32) -> (i32, i32, i32) {
    %c0_i32 = arith.constant 0 : i32
    %c0_i32_0 = arith.constant 0 : i32
    return %arg0, %c0_i32, %arg1 : i32, i32, i32
  }
}

module attributes {stable_mosaic.version = 11 : i64} {
  func.func @_stats_kernel(%arg0: i32, %arg1: i32, %arg2: i32, %arg3: memref<1x2x8xf32, #tpu.memory_space<vmem>>, %arg4: memref<1x1x8xf32, #tpu.memory_space<vmem>>, %arg5: memref<32x3xf32, #tpu.memory_space<vmem>>, %arg6: memref<32x2xf32, #tpu.memory_space<vmem>>, %arg7: memref<64x32xbf16, #tpu.memory_space<vmem>>, %arg8: memref<64x2xf32, #tpu.memory_space<vmem>>, %arg9: memref<32x2xf32, #tpu.memory_space<vmem>>, %arg10: memref<64x2xf32, #tpu.memory_space<vmem>>, %arg11: memref<32x1xf32, #tpu.memory_space<vmem>>, %arg12: memref<32x1xf32, #tpu.memory_space<vmem>>, %arg13: memref<64x1xf32, #tpu.memory_space<vmem>>, %arg14: memref<64x1xf32, #tpu.memory_space<vmem>>, %arg15: memref<32x2xf32, #tpu.memory_space<vmem>>) attributes {dimension_semantics = [#tpu.dimension_semantics<arbitrary>, #tpu.dimension_semantics<arbitrary>, #tpu.dimension_semantics<arbitrary>], iteration_bounds = array<i64: 2, 2, 1>, scalar_prefetch = 0 : i64, scratch_operands = 5 : i64, tpu.core_type = #tpu.core_type<tc>, window_params = [{transform_indices = @transform_0, window_bounds = array<i64: 1, 2, 8>}, {transform_indices = @transform_1, window_bounds = array<i64: 1, 1, 8>}, {pipeline_mode = #tpu.pipeline_mode<synchronous>, transform_indices = @transform_2, window_bounds = array<i64: 32, 3>}, {pipeline_mode = #tpu.pipeline_mode<synchronous>, transform_indices = @transform_3, window_bounds = array<i64: 32, 2>}, {pipeline_mode = #tpu.pipeline_mode<synchronous>, transform_indices = @transform_4, window_bounds = array<i64: 64, 32>}, {pipeline_mode = #tpu.pipeline_mode<synchronous>, transform_indices = @transform_5, window_bounds = array<i64: 64, 2>}, {pipeline_mode = #tpu.pipeline_mode<synchronous>, transform_indices = @transform_6, window_bounds = array<i64: 32, 2>}, {pipeline_mode = #tpu.pipeline_mode<synchronous>, transform_indices = @transform_7, window_bounds = array<i64: 64, 2>}]} {
    %c0_i32 = arith.constant 0 : i32
    %0 = arith.cmpi eq, %arg1, %c0_i32 : i32
    %c0_i32_0 = arith.constant 0 : i32
    %1 = arith.cmpi eq, %arg2, %c0_i32_0 : i32
    %2 = arith.andi %0, %1 : i1
    %c1_i32 = arith.constant 1 : i32
    %3 = arith.cmpi eq, %arg1, %c1_i32 : i32
    %c0_i32_1 = arith.constant 0 : i32
    %4 = arith.cmpi eq, %arg2, %c0_i32_1 : i32
    %5 = arith.andi %3, %4 : i1
    %c8_i32 = arith.constant 8 : i32
    %6 = arith.muli %arg2, %c8_i32 : i32
    %7 = tpu.iota {dimensions = array<i32: 1>} : vector<1x8xi32>
    %8 = vector.broadcast %6 : i32 to vector<1x8xi32>
    %9 = arith.addi %8, %7 : vector<1x8xi32>
    %c8_i32_2 = arith.constant 8 : i32
    %10 = vector.broadcast %c8_i32_2 : i32 to vector<1x8xi32>
    %11 = arith.cmpi slt, %9, %10 : vector<1x8xi32>
    %c0 = arith.constant 0 : index
    %c0_3 = arith.constant 0 : index
    %c0_4 = arith.constant 0 : index
    %12 = vector.load %arg3[%c0, %c0_3, %c0_4] : memref<1x2x8xf32, #tpu.memory_space<vmem>>, vector<1x2x8xf32>
    %13 = vector.shape_cast %12 : vector<1x2x8xf32> to vector<2x8xf32>
    %c0_5 = arith.constant 0 : index
    %c0_6 = arith.constant 0 : index
    %c0_7 = arith.constant 0 : index
    %14 = vector.load %arg4[%c0_5, %c0_6, %c0_7] : memref<1x1x8xf32, #tpu.memory_space<vmem>>, vector<1x1x8xf32>
    %15 = vector.shape_cast %14 : vector<1x1x8xf32> to vector<1x8xf32>
    %c0_8 = arith.constant 0 : index
    %c0_9 = arith.constant 0 : index
    %16 = vector.load %arg5[%c0_8, %c0_9] : memref<32x3xf32, #tpu.memory_space<vmem>>, vector<32x3xf32>
    %17 = vector.extract_strided_slice %16 {offsets = [0, 0], sizes = [32, 1], strides = [1, 1]} : vector<32x3xf32> to vector<32x1xf32>
    %18 = vector.extract_strided_slice %13 {offsets = [0, 0], sizes = [1, 8], strides = [1, 1]} : vector<2x8xf32> to vector<1x8xf32>
    %19 = vector.broadcast %17 : vector<32x1xf32> to vector<32x8xf32>
    %20 = vector.broadcast %18 : vector<1x8xf32> to vector<32x8xf32>
    %21 = arith.mulf %19, %20 : vector<32x8xf32>
    %22 = vector.extract_strided_slice %16 {offsets = [0, 1], sizes = [32, 1], strides = [1, 1]} : vector<32x3xf32> to vector<32x1xf32>
    %23 = vector.extract_strided_slice %13 {offsets = [1, 0], sizes = [1, 8], strides = [1, 1]} : vector<2x8xf32> to vector<1x8xf32>
    %24 = vector.broadcast %22 : vector<32x1xf32> to vector<32x8xf32>
    %25 = vector.broadcast %23 : vector<1x8xf32> to vector<32x8xf32>
    %26 = arith.mulf %24, %25 : vector<32x8xf32>
    %27 = arith.addf %21, %26 : vector<32x8xf32>
    %28 = vector.extract_strided_slice %16 {offsets = [0, 2], sizes = [32, 1], strides = [1, 1]} : vector<32x3xf32> to vector<32x1xf32>
    %29 = vector.broadcast %28 : vector<32x1xf32> to vector<32x8xf32>
    %30 = vector.broadcast %15 : vector<1x8xf32> to vector<32x8xf32>
    %31 = arith.mulf %29, %30 : vector<32x8xf32>
    %32 = arith.addf %27, %31 : vector<32x8xf32>
    %cst = arith.constant 0.000000e+00 : f32
    %33 = vector.shape_cast %11 : vector<1x8xi1> to vector<1x8xi1>
    %34 = vector.broadcast %33 : vector<1x8xi1> to vector<32x8xi1>
    %35 = vector.broadcast %cst : f32 to vector<32x8xf32>
    %36 = arith.select %34, %32, %35 : vector<32x8xi1>, vector<32x8xf32>
    %c0_i32_10 = arith.constant 0 : i32
    %37 = arith.cmpi eq, %arg0, %c0_i32_10 : i32
    %38 = arith.andi %37, %2 : i1
    %39 = arith.extui %38 : i1 to i32
    %c0_i32_11 = arith.constant 0 : i32
    %40 = arith.cmpi ne, %39, %c0_i32_11 : i32
    scf.if %40 {
      %cst_20 = arith.constant 0.000000e+00 : f32
      %55 = vector.broadcast %cst_20 : f32 to vector<32x1xf32>
      %c0_21 = arith.constant 0 : index
      %c0_22 = arith.constant 0 : index
      %56 = vector.load %arg11[%c0_21, %c0_22] : memref<32x1xf32, #tpu.memory_space<vmem>>, vector<32x1xf32>
      tpu.vector_store %arg11[%c0_21, %c0_22], %55 {strides = array<i32>} : memref<32x1xf32, #tpu.memory_space<vmem>>, vector<32x1xf32>,
      %cst_23 = arith.constant 0.000000e+00 : f32
      %57 = vector.broadcast %cst_23 : f32 to vector<32x1xf32>
      %c0_24 = arith.constant 0 : index
      %c0_25 = arith.constant 0 : index
      %58 = vector.load %arg12[%c0_24, %c0_25] : memref<32x1xf32, #tpu.memory_space<vmem>>, vector<32x1xf32>
      tpu.vector_store %arg12[%c0_24, %c0_25], %57 {strides = array<i32>} : memref<32x1xf32, #tpu.memory_space<vmem>>, vector<32x1xf32>,
    } else {
    }
    %c0_i32_12 = arith.constant 0 : i32
    %41 = arith.cmpi eq, %arg0, %c0_i32_12 : i32
    %42 = arith.extui %41 : i1 to i32
    %c0_i32_13 = arith.constant 0 : i32
    %43 = arith.cmpi ne, %42, %c0_i32_13 : i32
    scf.if %43 {
      %c0_20 = arith.constant 0 : index
      %c0_21 = arith.constant 0 : index
      %55 = vector.load %arg11[%c0_20, %c0_21] : memref<32x1xf32, #tpu.memory_space<vmem>>, vector<32x1xf32>
      %cst_22 = arith.constant dense<0.000000e+00> : vector<32xf32>
      %56 = vector.multi_reduction <add>, %36, %cst_22 [1] : vector<32x8xf32> to vector<32xf32>
      %57 = vector.shape_cast %56 : vector<32xf32> to vector<32x1xf32>
      %58 = arith.addf %55, %57 : vector<32x1xf32>
      %c0_23 = arith.constant 0 : index
      %c0_24 = arith.constant 0 : index
      %59 = vector.load %arg11[%c0_23, %c0_24] : memref<32x1xf32, #tpu.memory_space<vmem>>, vector<32x1xf32>
      tpu.vector_store %arg11[%c0_23, %c0_24], %58 {strides = array<i32>} : memref<32x1xf32, #tpu.memory_space<vmem>>, vector<32x1xf32>,
      %c0_25 = arith.constant 0 : index
      %c0_26 = arith.constant 0 : index
      %60 = vector.load %arg12[%c0_25, %c0_26] : memref<32x1xf32, #tpu.memory_space<vmem>>, vector<32x1xf32>
      %61 = arith.mulf %36, %36 : vector<32x8xf32>
      %cst_27 = arith.constant dense<0.000000e+00> : vector<32xf32>
      %62 = vector.multi_reduction <add>, %61, %cst_27 [1] : vector<32x8xf32> to vector<32xf32>
      %63 = vector.shape_cast %62 : vector<32xf32> to vector<32x1xf32>
      %64 = arith.addf %60, %63 : vector<32x1xf32>
      %c0_28 = arith.constant 0 : index
      %c0_29 = arith.constant 0 : index
      %65 = vector.load %arg12[%c0_28, %c0_29] : memref<32x1xf32, #tpu.memory_space<vmem>>, vector<32x1xf32>
      tpu.vector_store %arg12[%c0_28, %c0_29], %64 {strides = array<i32>} : memref<32x1xf32, #tpu.memory_space<vmem>>, vector<32x1xf32>,
    } else {
    }
    %c1_i32_14 = arith.constant 1 : i32
    %44 = arith.cmpi eq, %arg0, %c1_i32_14 : i32
    %45 = arith.andi %44, %2 : i1
    %46 = arith.extui %45 : i1 to i32
    %c0_i32_15 = arith.constant 0 : i32
    %47 = arith.cmpi ne, %46, %c0_i32_15 : i32
    scf.if %47 {
      %c0_20 = arith.constant 0 : index
      %c0_21 = arith.constant 0 : index
      %55 = vector.load %arg11[%c0_20, %c0_21] : memref<32x1xf32, #tpu.memory_space<vmem>>, vector<32x1xf32>
      %cst_22 = arith.constant 6.250000e-02 : f32
      %56 = vector.broadcast %cst_22 : f32 to vector<32x1xf32>
      %57 = arith.mulf %55, %56 : vector<32x1xf32>
      %c0_23 = arith.constant 0 : index
      %c0_24 = arith.constant 0 : index
      %58 = vector.load %arg12[%c0_23, %c0_24] : memref<32x1xf32, #tpu.memory_space<vmem>>, vector<32x1xf32>
      %cst_25 = arith.constant 6.250000e-02 : f32
      %59 = vector.broadcast %cst_25 : f32 to vector<32x1xf32>
      %60 = arith.mulf %58, %59 : vector<32x1xf32>
      %61 = arith.mulf %57, %57 : vector<32x1xf32>
      %62 = arith.subf %60, %61 : vector<32x1xf32>
      %c0_26 = arith.constant 0 : index
      %c0_27 = arith.constant 0 : index
      %63 = vector.load %arg6[%c0_26, %c0_27] : memref<32x2xf32, #tpu.memory_space<vmem>>, vector<32x1xf32>
      %cst_28 = arith.constant 9.99999974E-6 : f32
      %64 = vector.broadcast %cst_28 : f32 to vector<32x1xf32>
      %65 = arith.addf %62, %64 : vector<32x1xf32>
      %66 = math.rsqrt %65 : vector<32x1xf32>
      %67 = arith.mulf %63, %66 : vector<32x1xf32>
      %c0_29 = arith.constant 0 : index
      %c1 = arith.constant 1 : index
      %68 = vector.load %arg6[%c0_29, %c1] : memref<32x2xf32, #tpu.memory_space<vmem>>, vector<32x1xf32>
      %69 = arith.mulf %57, %67 : vector<32x1xf32>
      %70 = arith.subf %68, %69 : vector<32x1xf32>
      %71 = tpu.iota {dimensions = array<i32: 1>} : vector<32x2xi32>
      %c0_i32_30 = arith.constant 0 : i32
      %72 = vector.broadcast %c0_i32_30 : i32 to vector<32x2xi32>
      %73 = arith.cmpi eq, %71, %72 : vector<32x2xi32>
      %74 = vector.shape_cast %67 : vector<32x1xf32> to vector<32x1xf32>
      %75 = vector.broadcast %74 : vector<32x1xf32> to vector<32x2xf32>
      %76 = vector.shape_cast %70 : vector<32x1xf32> to vector<32x1xf32>
      %77 = vector.broadcast %76 : vector<32x1xf32> to vector<32x2xf32>
      %78 = arith.select %73, %75, %77 : vector<32x2xi1>, vector<32x2xf32>
      %c0_31 = arith.constant 0 : index
      %c0_32 = arith.constant 0 : index
      %79 = vector.load %arg15[%c0_31, %c0_32] : memref<32x2xf32, #tpu.memory_space<vmem>>, vector<32x2xf32>
      tpu.vector_store %arg15[%c0_31, %c0_32], %78 {strides = array<i32>} : memref<32x2xf32, #tpu.memory_space<vmem>>, vector<32x2xf32>,
      %cst_33 = arith.constant 0.000000e+00 : f32
      %80 = vector.broadcast %cst_33 : f32 to vector<64x1xf32>
      %c0_34 = arith.constant 0 : index
      %c0_35 = arith.constant 0 : index
      %81 = vector.load %arg13[%c0_34, %c0_35] : memref<64x1xf32, #tpu.memory_space<vmem>>, vector<64x1xf32>
      tpu.vector_store %arg13[%c0_34, %c0_35], %80 {strides = array<i32>} : memref<64x1xf32, #tpu.memory_space<vmem>>, vector<64x1xf32>,
      %cst_36 = arith.constant 0.000000e+00 : f32
      %82 = vector.broadcast %cst_36 : f32 to vector<64x1xf32>
      %c0_37 = arith.constant 0 : index
      %c0_38 = arith.constant 0 : index
      %83 = vector.load %arg14[%c0_37, %c0_38] : memref<64x1xf32, #tpu.memory_space<vmem>>, vector<64x1xf32>
      tpu.vector_store %arg14[%c0_37, %c0_38], %82 {strides = array<i32>} : memref<64x1xf32, #tpu.memory_space<vmem>>, vector<64x1xf32>,
    } else {
    }
    %c1_i32_16 = arith.constant 1 : i32
    %48 = arith.cmpi eq, %arg0, %c1_i32_16 : i32
    %49 = arith.extui %48 : i1 to i32
    %c0_i32_17 = arith.constant 0 : i32
    %50 = arith.cmpi ne, %49, %c0_i32_17 : i32
    scf.if %50 {
      %c0_20 = arith.constant 0 : index
      %c0_21 = arith.constant 0 : index
      %55 = vector.load %arg15[%c0_20, %c0_21] : memref<32x2xf32, #tpu.memory_space<vmem>>, vector<32x1xf32>
      %56 = vector.broadcast %55 : vector<32x1xf32> to vector<32x8xf32>
      %57 = arith.mulf %36, %56 : vector<32x8xf32>
      %c0_22 = arith.constant 0 : index
      %c1 = arith.constant 1 : index
      %58 = vector.load %arg15[%c0_22, %c1] : memref<32x2xf32, #tpu.memory_space<vmem>>, vector<32x1xf32>
      %59 = vector.broadcast %58 : vector<32x1xf32> to vector<32x8xf32>
      %60 = arith.addf %57, %59 : vector<32x8xf32>
      %cst_23 = arith.constant 0.000000e+00 : f32
      %61 = vector.broadcast %cst_23 : f32 to vector<32x8xf32>
      %62 = arith.maximumf %60, %61 : vector<32x8xf32>
      %c0_24 = arith.constant 0 : index
      %c0_25 = arith.constant 0 : index
      %63 = vector.load %arg7[%c0_24, %c0_25] : memref<64x32xbf16, #tpu.memory_space<vmem>>, vector<64x32xbf16>
      %64 = arith.truncf %62 : vector<32x8xf32> to vector<32x8xbf16>
      %cst_26 = arith.constant dense<0.000000e+00> : vector<64x8xf32>
      %65 = tpu.matmul %63, %64, %cst_26 {dimension_numbers = #tpu.dot_dimension_numbers<[1], [0], [0], [1], [0, 0, 1, 1], [], []>} : vector<64x32xbf16>, vector<32x8xbf16>, vector<64x8xf32> -> vector<64x8xf32>
      %cst_27 = arith.constant 0.000000e+00 : f32
      %66 = vector.shape_cast %11 : vector<1x8xi1> to vector<1x8xi1>
      %67 = vector.broadcast %66 : vector<1x8xi1> to vector<64x8xi1>
      %68 = vector.broadcast %cst_27 : f32 to vector<64x8xf32>
      %69 = arith.select %67, %65, %68 : vector<64x8xi1>, vector<64x8xf32>
      %c0_28 = arith.constant 0 : index
      %c0_29 = arith.constant 0 : index
      %70 = vector.load %arg13[%c0_28, %c0_29] : memref<64x1xf32, #tpu.memory_space<vmem>>, vector<64x1xf32>
      %cst_30 = arith.constant dense<0.000000e+00> : vector<64xf32>
      %71 = vector.multi_reduction <add>, %69, %cst_30 [1] : vector<64x8xf32> to vector<64xf32>
      %72 = vector.shape_cast %71 : vector<64xf32> to vector<64x1xf32>
      %73 = arith.addf %70, %72 : vector<64x1xf32>
      %c0_31 = arith.constant 0 : index
      %c0_32 = arith.constant 0 : index
      %74 = vector.load %arg13[%c0_31, %c0_32] : memref<64x1xf32, #tpu.memory_space<vmem>>, vector<64x1xf32>
      tpu.vector_store %arg13[%c0_31, %c0_32], %73 {strides = array<i32>} : memref<64x1xf32, #tpu.memory_space<vmem>>, vector<64x1xf32>,
      %c0_33 = arith.constant 0 : index
      %c0_34 = arith.constant 0 : index
      %75 = vector.load %arg14[%c0_33, %c0_34] : memref<64x1xf32, #tpu.memory_space<vmem>>, vector<64x1xf32>
      %76 = arith.mulf %69, %69 : vector<64x8xf32>
      %cst_35 = arith.constant dense<0.000000e+00> : vector<64xf32>
      %77 = vector.multi_reduction <add>, %76, %cst_35 [1] : vector<64x8xf32> to vector<64xf32>
      %78 = vector.shape_cast %77 : vector<64xf32> to vector<64x1xf32>
      %79 = arith.addf %75, %78 : vector<64x1xf32>
      %c0_36 = arith.constant 0 : index
      %c0_37 = arith.constant 0 : index
      %80 = vector.load %arg14[%c0_36, %c0_37] : memref<64x1xf32, #tpu.memory_space<vmem>>, vector<64x1xf32>
      tpu.vector_store %arg14[%c0_36, %c0_37], %79 {strides = array<i32>} : memref<64x1xf32, #tpu.memory_space<vmem>>, vector<64x1xf32>,
    } else {
    }
    %c1_i32_18 = arith.constant 1 : i32
    %51 = arith.cmpi eq, %arg0, %c1_i32_18 : i32
    %52 = arith.andi %51, %5 : i1
    %53 = arith.extui %52 : i1 to i32
    %c0_i32_19 = arith.constant 0 : i32
    %54 = arith.cmpi ne, %53, %c0_i32_19 : i32
    scf.if %54 {
      %c0_20 = arith.constant 0 : index
      %c0_21 = arith.constant 0 : index
      %55 = vector.load %arg13[%c0_20, %c0_21] : memref<64x1xf32, #tpu.memory_space<vmem>>, vector<64x1xf32>
      %cst_22 = arith.constant 6.250000e-02 : f32
      %56 = vector.broadcast %cst_22 : f32 to vector<64x1xf32>
      %57 = arith.mulf %55, %56 : vector<64x1xf32>
      %c0_23 = arith.constant 0 : index
      %c0_24 = arith.constant 0 : index
      %58 = vector.load %arg14[%c0_23, %c0_24] : memref<64x1xf32, #tpu.memory_space<vmem>>, vector<64x1xf32>
      %cst_25 = arith.constant 6.250000e-02 : f32
      %59 = vector.broadcast %cst_25 : f32 to vector<64x1xf32>
      %60 = arith.mulf %58, %59 : vector<64x1xf32>
      %61 = arith.mulf %57, %57 : vector<64x1xf32>
      %62 = arith.subf %60, %61 : vector<64x1xf32>
      %c0_26 = arith.constant 0 : index
      %c0_27 = arith.constant 0 : index
      %63 = vector.load %arg8[%c0_26, %c0_27] : memref<64x2xf32, #tpu.memory_space<vmem>>, vector<64x1xf32>
      %cst_28 = arith.constant 9.99999974E-6 : f32
      %64 = vector.broadcast %cst_28 : f32 to vector<64x1xf32>
      %65 = arith.addf %62, %64 : vector<64x1xf32>
      %66 = math.rsqrt %65 : vector<64x1xf32>
      %67 = arith.mulf %63, %66 : vector<64x1xf32>
      %c0_29 = arith.constant 0 : index
      %c1 = arith.constant 1 : index
      %68 = vector.load %arg8[%c0_29, %c1] : memref<64x2xf32, #tpu.memory_space<vmem>>, vector<64x1xf32>
      %69 = arith.mulf %57, %67 : vector<64x1xf32>
      %70 = arith.subf %68, %69 : vector<64x1xf32>
      %c0_30 = arith.constant 0 : index
      %c0_31 = arith.constant 0 : index
      %71 = vector.load %arg15[%c0_30, %c0_31] : memref<32x2xf32, #tpu.memory_space<vmem>>, vector<32x2xf32>
      %c0_32 = arith.constant 0 : index
      %c0_33 = arith.constant 0 : index
      %72 = vector.load %arg9[%c0_32, %c0_33] : memref<32x2xf32, #tpu.memory_space<vmem>>, vector<32x2xf32>
      tpu.vector_store %arg9[%c0_32, %c0_33], %71 {strides = array<i32>} : memref<32x2xf32, #tpu.memory_space<vmem>>, vector<32x2xf32>,
      %73 = tpu.iota {dimensions = array<i32: 1>} : vector<64x2xi32>
      %c0_i32_34 = arith.constant 0 : i32
      %74 = vector.broadcast %c0_i32_34 : i32 to vector<64x2xi32>
      %75 = arith.cmpi eq, %73, %74 : vector<64x2xi32>
      %76 = vector.shape_cast %67 : vector<64x1xf32> to vector<64x1xf32>
      %77 = vector.broadcast %76 : vector<64x1xf32> to vector<64x2xf32>
      %78 = vector.shape_cast %70 : vector<64x1xf32> to vector<64x1xf32>
      %79 = vector.broadcast %78 : vector<64x1xf32> to vector<64x2xf32>
      %80 = arith.select %75, %77, %79 : vector<64x2xi1>, vector<64x2xf32>
      %c0_35 = arith.constant 0 : index
      %c0_36 = arith.constant 0 : index
      %81 = vector.load %arg10[%c0_35, %c0_36] : memref<64x2xf32, #tpu.memory_space<vmem>>, vector<64x2xf32>
      tpu.vector_store %arg10[%c0_35, %c0_36], %80 {strides = array<i32>} : memref<64x2xf32, #tpu.memory_space<vmem>>, vector<64x2xf32>,
    } else {
    }
    return
  }
  func.func @transform_0(%arg0: i32, %arg1: i32, %arg2: i32) -> (i32, i32, i32) {
    %c0_i32 = arith.constant 0 : i32
    %c0_i32_0 = arith.constant 0 : i32
    return %arg1, %c0_i32, %arg2 : i32, i32, i32
  }
  func.func @transform_1(%arg0: i32, %arg1: i32, %arg2: i32) -> (i32, i32, i32) {
    %c0_i32 = arith.constant 0 : i32
    %c0_i32_0 = arith.constant 0 : i32
    return %arg1, %c0_i32, %arg2 : i32, i32, i32
  }
  func.func @transform_2(%arg0: i32, %arg1: i32, %arg2: i32) -> (i32, i32) {
    %c0_i32 = arith.constant 0 : i32
    %c0_i32_0 = arith.constant 0 : i32
    %c0_i32_1 = arith.constant 0 : i32
    return %c0_i32, %c0_i32_0 : i32, i32
  }
  func.func @transform_3(%arg0: i32, %arg1: i32, %arg2: i32) -> (i32, i32) {
    %c0_i32 = arith.constant 0 : i32
    %c0_i32_0 = arith.constant 0 : i32
    %c0_i32_1 = arith.constant 0 : i32
    return %c0_i32, %c0_i32_0 : i32, i32
  }
  func.func @transform_4(%arg0: i32, %arg1: i32, %arg2: i32) -> (i32, i32) {
    %c0_i32 = arith.constant 0 : i32
    %c0_i32_0 = arith.constant 0 : i32
    %c0_i32_1 = arith.constant 0 : i32
    return %c0_i32, %c0_i32_0 : i32, i32
  }
  func.func @transform_5(%arg0: i32, %arg1: i32, %arg2: i32) -> (i32, i32) {
    %c0_i32 = arith.constant 0 : i32
    %c0_i32_0 = arith.constant 0 : i32
    %c0_i32_1 = arith.constant 0 : i32
    return %c0_i32, %c0_i32_0 : i32, i32
  }
  func.func @transform_6(%arg0: i32, %arg1: i32, %arg2: i32) -> (i32, i32) {
    %c0_i32 = arith.constant 0 : i32
    %c0_i32_0 = arith.constant 0 : i32
    %c0_i32_1 = arith.constant 0 : i32
    return %c0_i32, %c0_i32_0 : i32, i32
  }
  func.func @transform_7(%arg0: i32, %arg1: i32, %arg2: i32) -> (i32, i32) {
    %c0_i32 = arith.constant 0 : i32
    %c0_i32_0 = arith.constant 0 : i32
    %c0_i32_1 = arith.constant 0 : i32
    return %c0_i32, %c0_i32_0 : i32, i32
  }
}

</mosaic_0001>

<bundles_post_ra>
// kernel: _lambda_.3
= control target key start
LH: loop header
LB: loop body
LE: loop exit
PB: predicated region body
PF: predicated region fallthrough
CT: control target
= control target key end

     0   :  { %13 = vsyncpa [#allocation3], 0  ;;  %s1329_s0 = inlined_call_operand.vmem [shape: f32[2,2,8], index: 0, kind: input, shape index: {}]   ;;  %s1330_s1 = inlined_call_operand.vmem [shape: f32[2,1,8], index: 1, kind: input, shape index: {}]   ;;  %s1331_s2 = inlined_call_operand.vmem [shape: f32[32,3], index: 2, kind: input, shape index: {}]   ;;  %s1332_s3 = inlined_call_operand.vmem [shape: f32[32,2], index: 3, kind: input, shape index: {}]   ;;  %s1333_s4 = inlined_call_operand.hbm [shape: bf16[64,32], index: 4, kind: input, shape index: {}]   ;;  %s1334_s5 = inlined_call_operand.vmem [shape: f32[64,2], index: 5, kind: input, shape index: {}]   ;;  %s1335_s6 = inlined_call_operand.hbm [shape: bf16[32,64], index: 6, kind: input, shape index: {}]   ;;  %s1336_s7 = inlined_call_operand.vmem [shape: f32[32,1], index: 7, kind: input, shape index: {}]   ;;  %s1337_s8 = inlined_call_operand.vmem [shape: f32[2,32,8], index: 8, kind: output, shape index: {}]  }
   0x1   :  { %14 = vsyncpa [#allocation5], 0  ;;  %s1169_s27 = smov 0   ;;  %s1171_s28 = smov 0  }
   0x2   :  { %s1173_s29 = smov 0  }
   0x3 LB: > { %s893_s30 = sadd.s32 4294967295, %s1115_s29   ;;  %s32_s9 = sadd.s32 1, %s1111_s28  ;;  %s1115_s29 = sphi %s1173_s29, %s20_s29   ;;  %s1111_s28 = sphi %s1171_s28, %s1341_s28   ;;  %s1107_s27 = sphi %s1169_s27, %s1340_s27  }
   0x4   : > { %p34_p0 = scmp.ge.s32.totalorder %s32_s9, 2  ;;  %p895_p1 = scmp.ge.s32.totalorder %s1115_s29, 1 }
   0x5   : > { %p247_p2 = scmp.lt.s32.totalorder %s1115_s29, 3  ;;  %p1194_p4 = scmp.eq.s32.totalorder %s893_s30, 0 }
   0x6   : > { %s1343_s9 = smov (%p34_p0, %s32_s9), 0  ;;  %s264_s14 = sshll.u32 %s1333_s4, 4  ;;  %s265_s14 = int_to_ptr.hbm [resolvable:$true] %s264_s14 }
   0x7   : > { %p1190_p3 = pnand %p895_p1, %p247_p2  ;;  %s1117_s15 = smov [#allocation2]  }
   0x8   : > { %s266_s16 = sshll.u32 %s1117_s15, 4  ;;  %s281_s19 = sshll.u32 %s1335_s6, 4  ;;  %s267_s16 = int_to_ptr.vmem [resolvable:$true] %s266_s16  ;;  %s282_s19 = int_to_ptr.hbm [resolvable:$true] %s281_s19 }
   0x9   : > { %p958_p5 = pneg %p1190_p3  ;;  %s1118_s20 = smov 64  }
   0xa   : > { %s1119_s21 = smov 4   ;;  %s1120_s22 = smov [#allocation4]  }
   0xb   : > { %p959_p6 = pnand %p1194_p4, %p958_p5  ;;  %s283_s23 = sshll.u32 %s1120_s22, 4  ;;  %s284_s23 = int_to_ptr.vmem [resolvable:$true] %s283_s23 }
   0xc   : > { %321 = sbr.rel (%p1190_p3) target bundleno = 520 (0x208), region = 52 }
   0xd   : > { %961 = dma.hbm_to_vmem [thread:$0]  (!%p959_p6), %s265_s14, 512, %s267_s16, [#allocation3], %s1118_s20, %s1118_s20, %s1119_s21  }
   0xe   : > { %964 = dma.hbm_to_vmem [thread:$0]  (!%p959_p6), %s282_s19, 256, %s284_s23, [#allocation5], %s1118_s20, %s1118_s20, %s1119_s21  }
  0x11   : > { %1098 = dma.done.wait (%p1194_p4), [#allocation3], 512  }
  0x12   : > { %1100 = vsyncadd (%p1194_p4), [#allocation3], 4294966784 }
  0x13   : > { %1102 = dma.done.wait (%p1194_p4), [#allocation5], 256  }
  0x14   : > { %1104 = vsyncadd (%p1194_p4), [#allocation5], 4294967040  ;;  %v1121_v0 = vmov 1   ;;  %p372_p7 = scmp.lt.s32.totalorder %s1107_s27, 1  ;;  %v1122_v1 = vmov 2   ;;  %v398_v2 = vld [vmem:[%s1331_s2 + $0x10] sm:$0xff] }
  0x15   : > { %1004 = vset.pattern.permute.xlu0 %v1121_v0  ;;  %1000 = vset.pattern.permute.xlu1 %v1121_v0  ;;  %v397_v3 = vld [vmem:[%s1331_s2 + $0x8] sm:$0xff]  ;;  %v399_v4 = vld [vmem:[%s1331_s2 + $0x18] sm:$0xff]  ;;  %v479_v5 = vld [vmem:[%s1332_s3 + $0x10] sm:$0xff]  ;;  %v1123_v6 = vmov 0   ;;  %vm559_vm0 = vcmask 261120   ;;  %vm747_vm1 = vcmask 523264  }
  0x16   : > { %1001 = vset.pattern.permute.xlu2 %v1122_v1  ;;  %s1345_s27 = smov (!%p372_p7, %s1107_s27), 1  ;;  %434 = vperm.xlu1 %1000, %v398_v2   ;;  %v396_v7 = vld [vmem:[%s1331_s2] sm:$0xff]  ;;  %v480_v8 = vld [vmem:[%s1332_s3 + $0x18] sm:$0xff]  ;;  %v478_v9 = vld [vmem:[%s1332_s3 + $0x8] sm:$0xff]  ;;  %vm773_vm2 = vcmask 64512  }
  0x17   : > { %s384_s12 = scalar_lea.vmem %s1330_s1, %s1345_s27  ;;  %430 = vperm.xlu0 %1004, %v397_v3   ;;  %459 = vperm.xlu2 %1001, %v398_v2   ;;  %v477_v10 = vld [vmem:[%s1332_s3] sm:$0xff]  ;;  %v607_v18 = vld [vmem:[%s1334_s5 + $0x30] sm:$0xff]  ;;  %s902_s30 = sshll.u32 %s1345_s27, 1  ;;  %v608_v22 = vld [vmem:[%s1334_s5 + $0x38] sm:$0xff] }
  0x18   : > { %s378_s13 = scalar_lea.vmem %s1329_s0, %s902_s30  ;;  %v606_v30 = vld [vmem:[%s1334_s5 + $0x28] sm:$0xff]  ;;  %v605_v31 = vld [vmem:[%s1334_s5 + $0x20] sm:$0xff]  ;;  %v603_v44 = vld [vmem:[%s1334_s5 + $0x10] sm:$0xff]  ;;  %s937_s20 = sshll.u32 %s1345_s27, 5 }
  0x19   : > { %v394_v23 = vld [vmem:[%s378_s13] sm:$0x3]  ;;  %v604_v61 = vld [vmem:[%s1334_s5 + $0x18] sm:$0xff]  ;;  %v602_v62 = vld [vmem:[%s1334_s5 + $0x8] sm:$0xff]  ;;  %s392_s23 = scalar_lea.vmem %s1337_s8, %s937_s20 }
  0x1a   : > { %v420_v24 = vperm.slane %v394_v23, 0  ;;  %v441_v27 = vperm.slane %v394_v23, 1  ;;  %v1024_v32 = vld [vmem:[%s384_s12] ss:$0 sm:$0xff] }
  0x1e   : > { %438 = vperm.xlu1 %1000, %v399_v4  }
  0x1f   : > { %514 = vperm.xlu0 %1004, %v479_v5   ;;  %463 = vperm.xlu2 %1001, %v399_v4  }
  0x26   : > { %1002 = vset.pattern.permute.xlu1 %v1123_v6 }
  0x27   : > { %1009 = vset.pattern.permute.xlu0 %v1123_v6  ;;  %407 = vperm.xlu1 %1002, %v397_v3  }
  0x28   : > { %412 = vperm.xlu0 %1009, %v398_v2   ;;  %1003 = vset.pattern.permute.xlu2 %v1121_v0 }
  0x29   : > { %426 = vperm.xlu2 %1003, %v396_v7  }
  0x2f   : > { %1005 = vset.pattern.permute.xlu1 %v1122_v1 }
  0x30   : > { %417 = vperm.xlu0 %1009, %v399_v4   ;;  %451 = vperm.xlu1 %1005, %v396_v7  }
  0x31   : > { %1006 = vset.pattern.permute.xlu2 %v1122_v1 }
  0x32   : > { %455 = vperm.xlu2 %1006, %v397_v3  }
  0x38   : > { %402 = vperm.xlu0 %1009, %v396_v7   ;;  %1007 = vset.pattern.permute.xlu1 %v1123_v6 }
  0x39   : > { %493 = vperm.xlu1 %1007, %v479_v5  }
  0x3a   : > { %1008 = vset.pattern.permute.xlu2 %v1123_v6 }
  0x3b   : > { %498 = vperm.xlu2 %1008, %v480_v8  }
  0x40   : > { %488 = vperm.xlu0 %1009, %v478_v9  }
  0x41   : > { %1010 = vset.pattern.permute.xlu1 %v1121_v0 }
  0x42   : > { %518 = vperm.xlu1 %1010, %v480_v8  }
  0x43   : > { %483 = vperm.xlu2 %1008, %v477_v10  }
  0x48   : > { %1014 = vset.pattern.permute.xlu0 %v1121_v0 }
  0x49   : > { %682 = vperm.xlu0 %1014, %v607_v18  }
  0x4a   : > { %506 = vperm.xlu1 %1010, %v477_v10  }
  0x4b   : > { %1011 = vset.pattern.permute.xlu2 %v1121_v0 }
  0x4c   : > { %510 = vperm.xlu2 %1011, %v478_v9  }
  0x51   : > { %678 = vperm.xlu0 %1014, %v606_v30  }
  0x52   : > { %1012 = vset.pattern.permute.xlu1 %v1123_v6 }
  0x53   : > { %641 = vperm.xlu1 %1012, %v607_v18   ;;  %v939_v18 = vld [vmem:[#allocation2 + $0x8] sm:$0xff] }
  0x54   : > { %1013 = vset.pattern.permute.xlu2 %v1123_v6 }
  0x55   : > { %646 = vperm.xlu2 %1013, %v608_v22  }
  0x59   : > { %666 = vperm.xlu0 %1014, %v603_v44  }
  0x5b   : > { %1015 = vset.pattern.permute.xlu1 %v1121_v0 }
  0x5c   : > { %686 = vperm.xlu1 %1015, %v608_v22  }
  0x5d   : > { %631 = vperm.xlu2 %1013, %v605_v31  }
  0x61   : > { %1020 = vset.pattern.permute.xlu0 %v1123_v6 }
  0x62   : > { %616 = vperm.xlu0 %1020, %v602_v62  }
  0x64   : > { %1016 = vset.pattern.permute.xlu1 %v1123_v6 }
  0x65   : > { %636 = vperm.xlu1 %1016, %v606_v30   ;;  %1017 = vset.pattern.permute.xlu2 %v1121_v0 }
  0x66   : > { %674 = vperm.xlu2 %1017, %v605_v31  }
  0x6d   : > { %621 = vperm.xlu1 %1016, %v603_v44  }
  0x6e   : > { %1018 = vset.pattern.permute.xlu2 %v1123_v6 }
  0x6f   : > { %626 = vperm.xlu2 %1018, %v604_v61  }
  0x71   : > { %v460_v11 = vpop.permute.xlu2 %459 }
  0x72   : > { %v471_v38 = vmul.f32 %v1024_v32, %v460_v11  ;;  %v715_v11 = vld [vmem:[%s1336_s7 + $0x10] sm:$0xff] }
  0x73   : > { %729 = vperm.xlu0 %1020, %v715_v11   ;;  %v942_v11 = vld [vmem:[#allocation4] sm:$0xff] }
  0x75   : > { %1019 = vset.pattern.permute.xlu1 %v1121_v0 }
  0x76   : > { %670 = vperm.xlu1 %1019, %v604_v61  }
  0x79   : > { %v464_v12 = vpop.permute.xlu2 %463 }
  0x7a   : > { %v472_v41 = vmul.f32 %v1024_v32, %v464_v12  ;;  %v601_v12 = vld [vmem:[%s1334_s5] sm:$0xff] }
  0x7b   : > { %611 = vperm.xlu2 %1018, %v601_v12  }
  0x7e   : > { %658 = vperm.xlu1 %1019, %v601_v12   ;;  %v943_v12 = vld [vmem:[#allocation4 + $0x8] sm:$0xff] }
  0x83   : > { %v427_v15 = vpop.permute.xlu2 %426  ;;  %1021 = vset.pattern.permute.xlu2 %v1121_v0 }
  0x84   : > { %v442_v50 = vmul.f32 %v441_v27, %v427_v15  ;;  %662 = vperm.xlu2 %1021, %v602_v62  }
  0x86   : > { %1022 = vset.pattern.permute.xlu1 %v1123_v6 }
  0x88   : > { %v435_v13 = vpop.permute.xlu1 %434 }
  0x89   : > { %v431_v14 = vpop.permute.xlu0 %430  ;;  %v444_v33 = vmul.f32 %v441_v27, %v435_v13 }
  0x8a   : > { %v443_v46 = vmul.f32 %v441_v27, %v431_v14 }
  0x8c   : > { %v456_v21 = vpop.permute.xlu2 %455  ;;  %1023 = vset.pattern.permute.xlu2 %v1123_v6  ;;  %v713_v6 = vld [vmem:[%s1336_s7] sm:$0xff] }
  0x8d   : > { %v470_v52 = vmul.f32 %v1024_v32, %v456_v21  ;;  %719 = vperm.xlu1 %1022, %v713_v6  }
  0x90   : > { %v439_v16 = vpop.permute.xlu1 %438 }
  0x91   : > { %v515_v17 = vpop.permute.xlu0 %514  ;;  %v445_v35 = vmul.f32 %v441_v27, %v439_v16  ;;  %v938_v16 = vld [vmem:[#allocation2] sm:$0xff] }
  0x95   : > { %v499_v28 = vpop.permute.xlu2 %498 }
  0x99   : > { %v408_v20 = vpop.permute.xlu1 %407 }
  0x9a   : > { %v413_v19 = vpop.permute.xlu0 %412  ;;  %v422_v42 = vmul.f32 %v420_v24, %v408_v20 }
  0x9b   : > { %v423_v29 = vmul.f32 %v420_v24, %v413_v19  ;;  %v941_v19 = vld [vmem:[#allocation2 + $0x18] sm:$0xff] }
  0x9c   : > { %v447_v51 = vadd.f32 %v443_v46, %v422_v42 }
  0x9d   : > { %v448_v36 = vadd.f32 %v444_v33, %v423_v29  ;;  %v484_v45 = vpop.permute.xlu2 %483 }
  0x9e   : > { %v474_v59 = vadd.f32 %v470_v52, %v447_v51 }
  0x9f   : > { %v475_v43 = vadd.f32 %v471_v38, %v448_v36 }
  0xa2   : > { %v418_v25 = vpop.permute.xlu0 %417  ;;  %v452_v26 = vpop.permute.xlu1 %451 }
  0xa3   : > { %v424_v34 = vmul.f32 %v420_v24, %v418_v25  ;;  %v469_v58 = vmul.f32 %v1024_v32, %v452_v26 }
  0xa5   : > { %v449_v39 = vadd.f32 %v445_v35, %v424_v34  ;;  %v714_v35 = vld [vmem:[%s1336_s7 + $0x8] sm:$0xff] }
  0xa6   : > { %v511_v4 = vpop.permute.xlu2 %510  ;;  %724 = vperm.xlu2 %1023, %v714_v35  }
  0xa7   : > { %v476_v47 = vadd.f32 %v472_v41, %v449_v39 }
  0xa9   : > { %v504_v53 = vmul.f32 %v499_v28, %v476_v47 }
  0xaa   : > { %v403_v37 = vpop.permute.xlu0 %402 }
  0xab   : > { %v494_v40 = vpop.permute.xlu1 %493  ;;  %v421_v48 = vmul.f32 %v420_v24, %v403_v37 }
  0xac   : > { %v503_v49 = vmul.f32 %v494_v40, %v475_v43  ;;  %v716_v40 = vld [vmem:[%s1336_s7 + $0x18] sm:$0xff] }
  0xad   : > { %v446_v54 = vadd.f32 %v442_v50, %v421_v48  ;;  %734 = vperm.xlu1 %1022, %v716_v40  }
  0xae   : > { %v523_v55 = vadd.f32 %v515_v17, %v503_v49  ;;  %v940_v17 = vld [vmem:[#allocation2 + $0x10] sm:$0xff] }
  0xaf   : > { %v473_v1 = vadd.f32 %v469_v58, %v446_v54  ;;  %v647_v21 = vpop.permute.xlu2 %646 }
  0xb0   : > { %v527_v63 = vmax.f32 %v523_v55, 0.0 }
  0xb1   : > { %v501_v7 = vmul.f32 %v484_v45, %v473_v1 }
  0xb2   : > { %v489_v56 = vpop.permute.xlu0 %488 }
  0xb3   : > { %v502_v2 = vmul.f32 %v489_v56, %v474_v59 }
  0xb4   : > { %v519_v57 = vpop.permute.xlu1 %518 }
  0xb5   : > { %v524_v60 = vadd.f32 %v519_v57, %v504_v53  ;;  %v522_v8 = vadd.f32 %v511_v4, %v502_v2 }
  0xb7   : > { %v528_v3 = vmax.f32 %v524_v60, 0.0  ;;  %v526_v13 = vmax.f32 %v522_v8, 0.0  ;;  %v632_v23 = vpop.permute.xlu2 %631 }
  0xb9   : > { %v538_v5 = vpack.c.bf16 %v528_v3, %v527_v63 }
  0xbb   : > { %578 = vmatpush.bf16.msra.mxu0 %v538_v5  ;;  %944 = vmatpush.bf16.msra.mxu2 %v538_v5  ;;  %v683_v25 = vpop.permute.xlu0 %682 }
  0xbc   : > { %v507_v9 = vpop.permute.xlu1 %506 }
  0xbd   : > { %v521_v10 = vadd.f32 %v507_v9, %v501_v7 }
  0xbf   : > { %v525_v14 = vmax.f32 %v521_v10, 0.0 }
  0xc0   : > { %v675_v28 = vpop.permute.xlu2 %674 }
  0xc1   : > { %v537_v15 = vpack.c.bf16 %v526_v13, %v525_v14 }
  0xc3   : > { %579 = vmatpush.bf16.msra.mxu0 %v537_v15  ;;  %945 = vmatpush.bf16.msra.mxu2 %v537_v15  ;;  %v679_v30 = vpop.permute.xlu0 %678 }
  0xc5   : > { %v642_v20 = vpop.permute.xlu1 %641 }
  0xc6   : > { %921 = vmatmul.msk.bf16.vlgmr.msra.gmra.mxu0 %vm559_vm0, %v938_v16  ;;  %923 = vmatmul.msk.bf16.vlgmr.msra.gmra.mxu2 %vm559_vm0, %v940_v17 }
  0xc9   : > { %v627_v32 = vpop.permute.xlu2 %626 }
  0xcb   : > { %v667_v36 = vpop.permute.xlu0 %666 }
  0xce   : > { %v687_v22 = vpop.permute.xlu1 %686 }
  0xd4   : > { %v617_v50 = vpop.permute.xlu0 %616 }
  0xd5   : > { %v612_v39 = vpop.permute.xlu2 %611 }
  0xd6   : > { %922 = vmatmul.msk.bf16.gmra.mxu0 %vm559_vm0, %v939_v18  ;;  %924 = vmatmul.msk.bf16.gmra.mxu2 %vm559_vm0, %v941_v19 }
  0xd7   : > { %v637_v27 = vpop.permute.xlu1 %636 }
  0xde   : > { %v663_v61 = vpop.permute.xlu2 %662 }
  0xdf   : > { %v622_v0 = vpop.permute.xlu1 %621 }
  0xe5   : > { %v730_v16 = vpop.permute.xlu0 %729 }
  0xe8   : > { %v671_v38 = vpop.permute.xlu1 %670 }
  0xf0   : > { %v659_v60 = vpop.permute.xlu1 %658 }
  0xff   : > { %v720_v13 = vpop.permute.xlu1 %719 }
 0x100   : > { %v725_v18 = vpop.permute.xlu2 %724 }
 0x143   : > { %v581_v24 = vpop.f32.mrf.mxu0 }
 0x144   : > { %v649_v55 = vmul.f32 %v612_v39, %v581_v24 }
 0x146   : > { %v689_v1 = vadd.f32 %v659_v60, %v649_v55 }
 0x148   : > { %v697_v7 = vmax.f32 %v689_v1, 0.0 }
 0x149   : > { %v591_v26 = vpop.f32.mrf.mxu2 }
 0x14a   : > { %v653_v44 = vmul.f32 %v632_v23, %v591_v26 }
 0x14b   : > { %v583_v29 = vpop.f32.mrf.mxu0 }
 0x14c   : > { %v693_v51 = vadd.f32 %v675_v28, %v653_v44  ;;  %v650_v56 = vmul.f32 %v617_v50, %v583_v29 }
 0x14e   : > { %v701_v62 = vmax.f32 %v693_v51, 0.0  ;;  %v690_v2 = vadd.f32 %v663_v61, %v650_v56 }
 0x150   : > { %v698_v8 = vmax.f32 %v690_v2, 0.0 }
 0x151   : > { %v593_v31 = vpop.f32.mrf.mxu2 }
 0x152   : > { %v654_v41 = vmul.f32 %v637_v27, %v593_v31  ;;  %v709_v10 = vpack.c.bf16 %v698_v8, %v697_v7 }
 0x153   : > { %v586_v33 = vpop.f32.mrf.mxu0 }
 0x154   : > { %v694_v47 = vadd.f32 %v679_v30, %v654_v41  ;;  %v651_v52 = vmul.f32 %v622_v0, %v586_v33 }
 0x156   : > { %v702_v57 = vmax.f32 %v694_v47, 0.0  ;;  %v691_v63 = vadd.f32 %v667_v36, %v651_v52 }
 0x158   : > { %v711_v4 = vpack.c.bf16 %v702_v57, %v701_v62  ;;  %v699_v5 = vmax.f32 %v691_v63, 0.0 }
 0x159   : > { %v596_v34 = vpop.f32.mrf.mxu2 }
 0x15a   : > { %v655_v37 = vmul.f32 %v642_v20, %v596_v34 }
 0x15b   : > { %v588_v42 = vpop.f32.mrf.mxu0 }
 0x15c   : > { %v695_v45 = vadd.f32 %v683_v25, %v655_v37  ;;  %v652_v48 = vmul.f32 %v627_v32, %v588_v42 }
 0x15e   : > { %v703_v53 = vmax.f32 %v695_v45, 0.0  ;;  %v692_v58 = vadd.f32 %v671_v38, %v652_v48 }
 0x160   : > { %v700_v3 = vmax.f32 %v692_v58, 0.0 }
 0x161   : > { %v598_v43 = vpop.f32.mrf.mxu2 }
 0x162   : > { %v656_v46 = vmul.f32 %v647_v21, %v598_v43  ;;  %v710_v9 = vpack.c.bf16 %v700_v3, %v699_v5 }
 0x164   : > { %v696_v49 = vadd.f32 %v687_v22, %v656_v46  ;;  %v735_v22 = vpop.permute.xlu1 %734 }
 0x166   : > { %v704_v54 = vmax.f32 %v696_v49, 0.0 }
 0x168   : > { %v712_v59 = vpack.c.bf16 %v704_v54, %v703_v53 }
 0x16a   : > { %758 = vmatpush.bf16.msra.mxu1 %v712_v59  ;;  %946 = vmatpush.bf16.msra.mxu3 %v712_v59 }
 0x16e   : > { %759 = vmatpush.bf16.msra.mxu1 %v711_v4  ;;  %947 = vmatpush.bf16.msra.mxu3 %v711_v4 }
 0x172   : > { %760 = vmatpush.bf16.msra.mxu1 %v710_v9  ;;  %948 = vmatpush.bf16.msra.mxu3 %v710_v9 }
 0x176   : > { %761 = vmatpush.bf16.msra.mxu1 %v709_v10  ;;  %949 = vmatpush.bf16.msra.mxu3 %v709_v10 }
 0x179   : > { %933 = vmatmul.msk.bf16.vlgmr.msra.gmra.mxu1 %vm747_vm1, %v942_v11  ;;  %934 = vmatmul.msk.bf16.vlgmr.msra.gmra.mxu3 %vm747_vm1, %v943_v12 }
 0x1f6   : > { %v763_v14 = vpop.f32.mrf.mxu1 }
 0x1f7   : > { %v764_v15 = vadd.f32 %v763_v14, %v720_v13 }
 0x1f9   : > { %774 = vst.msk [vmem:[%s392_s23] sm:$0xff] %vm773_vm2, %v764_v15 }
 0x1fc   : > { %v768_v17 = vpop.f32.mrf.mxu3 }
 0x1fd   : > { %v769_v19 = vadd.f32 %v768_v17, %v730_v16 }
 0x1fe   : > { %v765_v20 = vpop.f32.mrf.mxu1 }
 0x1ff   : > { %776 = vst.msk [vmem:[%s392_s23 + $0x10] sm:$0xff] %vm773_vm2, %v769_v19  ;;  %v766_v21 = vadd.f32 %v765_v20, %v725_v18 }
 0x201   : > { %775 = vst.msk [vmem:[%s392_s23 + $0x8] sm:$0xff] %vm773_vm2, %v766_v21 }
 0x204   : > { %v770_v23 = vpop.f32.mrf.mxu3 }
 0x205   : > { %v771_v24 = vadd.f32 %v770_v23, %v735_v22 }
 0x207   : > { %777 = vst.msk [vmem:[%s392_s23 + $0x18] sm:$0xff] %vm773_vm2, %v771_v24 }
 0x208 PF: > { %s20_s29 = sadd.s32 1, %s1115_s29   ;;  %s1340_s27 = smov %s1111_s28 }
 0x209   : > { %p17_p8 = scmp.ge.s32.totalorder %s20_s29, 4   ;;  %s1341_s28 = smov %s1343_s9 }
 0x20b   :  { %19 = sbr.rel (!%p17_p8) target bundleno = 3 (0x3), region = 94 }
 0x210   :  { %805 = vsyncpa [#allocation3], 1 }
 0x211   :  { %807 = vsyncpa [#allocation3 + $0x1], 1 }
 0x212   :  { %808 = vsyncpa [#allocation5], 1 }

// kernel: _lambda_.2
= control target key start
LH: loop header
LB: loop body
LE: loop exit
PB: predicated region body
PF: predicated region fallthrough
CT: control target
= control target key end

     0   :  { %s2627_s0 = inlined_call_operand.hbm [shape: f32[2,2,8], index: 0, kind: input, shape index: {}]   ;;  %s2628_s1 = inlined_call_operand.hbm [shape: f32[2,1,8], index: 1, kind: input, shape index: {}]   ;;  %s2629_s2 = inlined_call_operand.hbm [shape: f32[32,3], index: 2, kind: input, shape index: {}]   ;;  %s2630_s3 = inlined_call_operand.hbm [shape: f32[32,2], index: 3, kind: input, shape index: {}]   ;;  %s2631_s4 = inlined_call_operand.hbm [shape: bf16[64,32], index: 4, kind: input, shape index: {}]   ;;  %s2632_s5 = inlined_call_operand.hbm [shape: f32[64,2], index: 5, kind: input, shape index: {}]   ;;  %s2633_s6 = inlined_call_operand.vmem [shape: f32[32,2], index: 6, kind: output, shape index: {0}]   ;;  %s2634_s7 = inlined_call_operand.vmem [shape: f32[64,2], index: 7, kind: output, shape index: {1}]  }
   0x1   :  { %2638 = sst [smem:[#allocation26_spill]] %s2629_s2 }
   0x2   :  { %2639 = sst [smem:[#allocation27_spill]] %s2630_s3 }
   0x3   :  { %2640 = sst [smem:[#allocation28_spill]] %s2631_s4 }
   0x4   :  { %2641 = sst [smem:[#allocation29_spill]] %s2632_s5 }
   0x5   :  { %13 = vsyncpa [#allocation8], 0 }
   0x6   :  { %15 = vsyncpa [#allocation8 + $0x1], 0 }
   0x7   :  { %16 = vsyncpa [#allocation10], 0 }
   0x8   :  { %18 = vsyncpa [#allocation10 + $0x1], 0 }
   0x9   :  { %19 = vsyncpa [#allocation13], 0 }
   0xa   :  { %20 = vsyncpa [#allocation16], 0  ;;  %s1984_s24 = smov 0   ;;  %s1986_s25 = smov 0  }
   0xb   :  { %s1988_s26 = smov 0   ;;  %s1990_s27 = smov 0  }
   0xc   :  { %s1992_s28 = smov 0   ;;  %s1994_s29 = smov 0  }
   0xd   :  { %s1996_s30 = smov 0   ;;  %s1998_s8 = smov 0  }
   0xe LB: > { %2642 = sst [smem:[#allocation22_spill]] %s1917_s30  ;;  %s2635_s9 = sadd.s32 4294967295, %s1921_s8   ;;  %s1921_s8 = sphi %s1998_s8, %s26_s8   ;;  %s1917_s30 = sphi %s1996_s30, %s2678_s30   ;;  %s1913_s29 = sphi %s1994_s29, %s2683_s29   ;;  %s1909_s28 = sphi %s1992_s28, %s2676_s28   ;;  %s1905_s27 = sphi %s1990_s27, %s2682_s27   ;;  %s1901_s26 = sphi %s1988_s26, %s2681_s26   ;;  %s1897_s25 = sphi %s1986_s25, %s2680_s25   ;;  %s1893_s24 = sphi %s1984_s24, %s2679_s24  }
   0xf   : > { %p1424_p0 = scmp.ge.s32.totalorder %s1921_s8, 1  ;;  %p2028_p1 = scmp.eq.s32.totalorder %s2635_s9, 0 }
  0x10   : > { %p232_p2 = scmp.lt.s32.totalorder %s1921_s8, 5  ;;  %s2644_s2 = sld [smem:[#allocation26_spill]] }
  0x11   : > { %s1923_s15 = smov [#allocation11]   ;;  %s2647_s3 = sld [smem:[#allocation27_spill]] }
  0x12   : > { %p2036_p3 = pnand %p1424_p0, %p232_p2  ;;  %s245_s16 = sshll.u32 %s1923_s15, 4  ;;  %s246_s16 = int_to_ptr.vmem [resolvable:$true] %s245_s16 }
  0x13   : > { %s1924_s21 = smov 128   ;;  %s1925_s22 = smov 8  }
  0x14   : > { %p1496_p4 = pneg %p2036_p3  ;;  %s1926_s23 = smov [#allocation12]  }
  0x15   : > { %s259_s11 = sshll.u32 %s1926_s23, 4  ;;  %s2648_s4 = sld [smem:[#allocation28_spill]]  ;;  %s260_s11 = int_to_ptr.vmem [resolvable:$true] %s259_s11 }
  0x16   : > { %s243_s13 = sshll.u32 %s2644_s2, 4  ;;  %p2044_p5 = pnand %p1496_p4, %p2028_p1  ;;  %s244_s13 = int_to_ptr.hbm [resolvable:$true] %s243_s13 }
  0x17   : > { %s257_s20 = sshll.u32 %s2647_s3, 4  ;;  %s1927_s18 = smov [#allocation14]   ;;  %s258_s20 = int_to_ptr.hbm [resolvable:$true] %s257_s20 }
  0x18   : > { %1499 = dma.hbm_to_vmem [thread:$0]  (!%p2044_p5), %s244_s13, 512, %s246_s16, [#allocation10], %s1924_s21, %s1924_s21, %s1925_s22  }
  0x19   : > { %1502 = dma.hbm_to_vmem [thread:$0]  (!%p2044_p5), %s258_s20, 512, %s260_s11, [#allocation13], %s1924_s21, %s1924_s21, %s1925_s22  }
  0x1a   : > { %s273_s19 = sshll.u32 %s1927_s18, 4  ;;  %s2649_s5 = sld [smem:[#allocation29_spill]]  ;;  %s274_s19 = int_to_ptr.vmem [resolvable:$true] %s273_s19 }
  0x1b   : > { %s271_s9 = sshll.u32 %s2648_s4, 4  ;;  %s1928_s12 = smov 64   ;;  %s272_s9 = int_to_ptr.hbm [resolvable:$true] %s271_s9 }
  0x1c   : > { %s1929_s15 = smov 4   ;;  %s1930_s2 = smov [#allocation15]  }
  0x1d   : > { %1505 = dma.hbm_to_vmem [thread:$0]  (!%p2044_p5), %s272_s9, 512, %s274_s19, [#allocation13], %s1928_s12, %s1928_s12, %s1929_s15  }
  0x1e   : > { %s287_s20 = sshll.u32 %s1930_s2, 4  ;;  %s41_s11 = sadd.s32 1, %s1913_s29  ;;  %s288_s20 = int_to_ptr.vmem [resolvable:$true] %s287_s20 }
  0x1f   : > { %s45_s18 = sadd.s32 1, %s1917_s30  ;;  %p43_p6 = scmp.ge.s32.totalorder %s41_s11, 2 }
  0x20   : > { %s285_s23 = sshll.u32 %s2649_s5, 4  ;;  %s54_s13 = sadd.s32 1, %s1901_s26  ;;  %s286_s23 = int_to_ptr.hbm [resolvable:$true] %s285_s23 }
  0x21   : > { %1508 = dma.hbm_to_vmem [thread:$0]  (!%p2044_p5), %s286_s23, 1024, %s288_s20, [#allocation16], %s1924_s21, %s1924_s21, %s1925_s22  }
  0x22   : > { %p61_p7 = scmp.ne.s32.totalorder %s1901_s26, %s1897_s25  ;;  %p62_p8 = scmp.eq.s32.totalorder %s1921_s8, 0 }
  0x23   : > { %s2685_s11 = smov (%p43_p6, %s41_s11), 0  ;;  %s2687_s18 = smov (!%p43_p6, %s45_s18), %s1917_s30 }
  0x24   : > { %2650 = sst [smem:[#allocation23_spill]] %s2685_s11  ;;  %s49_s9 = ssub.s32 %s1913_s29, %s2685_s11 }
  0x25   : > { %p2076_p9 = por %p62_p8, %p61_p7  ;;  %p47_p10 = scmp.ge.s32.totalorder %s2687_s18, 2 }
  0x26   : > { %p52_p11 = scmp.eq.s32.totalorder %s49_s9, 0  ;;  %p67_p12 = scmp.ne.s32.totalorder %s1897_s25, %s1893_s24 }
  0x27   : > { %p1520_p13 = scmp.lt.s32.totalorder %s1921_s8, 4  ;;  %s2689_s18 = smov (%p47_p10, %s2687_s18), 0 }
  0x28   : > { %2652 = sst [smem:[#allocation24_spill]] %s2689_s18  ;;  %p2090_p0 = por %p2028_p1, %p67_p12 }
  0x29   : > { %s2086_s17 = scalar_select %p52_p11, %s1901_s26, %s54_s13  }
  0x2a   : > { %s301_s22 = sand.u32 1, %s1901_s26   ;;  %s1431_s16 = sshll.u32 %s1913_s29, 1 }
  0x2b   : > { %2653 = sst [smem:[#allocation25_spill]] %s2086_s17  ;;  %s1430_s19 = sshll.u32 %s301_s22, 1 }
  0x2c   : > { %s310_s15 = scalar_lea.hbm %s2627_s0, %s1431_s16  ;;  %s305_s20 = scalar_lea.vmem [#allocation7], %s1430_s19 }
  0x2d   : > { %s314_s24 = sshll.u32 %s305_s20, 4  ;;  %s312_s9 = sshll.u32 %s310_s15, 4  ;;  %s315_s24 = int_to_ptr.vmem [resolvable:$true] %s314_s24  ;;  %s313_s9 = int_to_ptr.hbm [resolvable:$true] %s312_s9 }
  0x2e   : > { %p1510_p2 = pnand %p1520_p13, %p2076_p9  ;;  %s321_s13 = sand.u32 1, %s1921_s8  }
  0x2f   : > { %s302_s3 = scalar_lea.sflag [#allocation8], %s301_s22  ;;  %s328_s18 = scalar_lea.hbm %s2628_s1, %s1913_s29 }
  0x30   : > { %1512 = dma.hbm_to_vmem [thread:$0]  (!%p1510_p2), %s313_s9, 32, %s315_s24, %s302_s3  }
  0x31   : > { %s324_s11 = scalar_lea.vmem [#allocation9], %s301_s22  ;;  %s330_s17 = sshll.u32 %s328_s18, 4  ;;  %s331_s17 = int_to_ptr.hbm [resolvable:$true] %s330_s17 }
  0x32   : > { %s332_s30 = sshll.u32 %s324_s11, 4  ;;  %s322_s19 = scalar_lea.sflag [#allocation10], %s321_s13  ;;  %s333_s30 = int_to_ptr.vmem [resolvable:$true] %s332_s30 }
  0x33   : > { %1515 = dma.hbm_to_vmem [thread:$0]  (!%p1510_p2), %s331_s17, 16, %s333_s30, %s322_s19  }
  0x34   : > { %341 = sbr.rel (%p2036_p3) target bundleno = 1388 (0x56c), region = 44  ;;  %s2111_s2 = sand.u32 (!%p2036_p3), 1, %s1897_s25  }
  0x35   : > { %s1433_s3 = sshll.u32 (!%p2036_p3), %s2111_s2, 1  ;;  %s344_s16 = scalar_lea.sflag (!%p2036_p3), [#allocation8], %s2111_s2 }
  0x36   : > { %s2115_s4 = scalar_lea.vmem (!%p2036_p3), [#allocation7], %s1433_s3 }
  0x39   : > { %1872 = dma.done.wait (%p2090_p0), %s344_s16, 32  }
  0x3a   : > { %1874 = vsyncadd (%p2090_p0), %s344_s16, 4294967264  ;;  %s2655_s5 = sadd.s32 4294967295, %s1921_s8   ;;  %s356_s11 = scalar_lea.vmem [#allocation9], %s2111_s2 }
  0x3b   : > { %s353_s30 = sand.u32 1, %s2655_s5  }
  0x3c   : > { %s354_s14 = scalar_lea.sflag [#allocation10], %s353_s30 }
  0x3d   : > { %1876 = dma.done.wait (%p2090_p0), %s354_s14, 16  }
  0x3e   : > { %1878 = vsyncadd (%p2090_p0), %s354_s14, 4294967280 }
  0x3f   : > { %1880 = dma.done.wait (%p2028_p1), [#allocation10], 512  }
  0x40   : > { %1882 = vsyncadd (%p2028_p1), [#allocation10], 4294966784 }
  0x41   : > { %1884 = dma.done.wait (%p2028_p1), [#allocation13], 1024  }
  0x42   : > { %1886 = vsyncadd (%p2028_p1), [#allocation13], 4294966272 }
  0x43   : > { %1888 = dma.done.wait (%p2028_p1), [#allocation16], 1024  }
  0x44   : > { %1890 = vsyncadd (%p2028_p1), [#allocation16], 4294966272  ;;  %v1931_v0 = vmov 0   ;;  %v1932_v1 = vmov 1   ;;  %v425_v2 = vld [vmem:[#allocation11 + $0x10] sm:$0xff]  ;;  %v423_v3 = vld [vmem:[#allocation11] sm:$0xff]  ;;  %v416_v11 = vlaneseq }
  0x45   : > { %1611 = vset.pattern.permute.xlu1 %v1931_v0  ;;  %1610 = vset.pattern.permute.xlu0 %v1931_v0  ;;  %v426_v4 = vld [vmem:[#allocation11 + $0x18] sm:$0xff]  ;;  %v424_v5 = vld [vmem:[#allocation11 + $0x8] sm:$0xff]  ;;  %p408_p1 = scmp.eq.s32.totalorder %s1905_s27, 0  ;;  %p510_p3 = scmp.eq.s32.totalorder %s1909_s28, 0  ;;  %v1933_v6 = vmov 2  }
  0x46   : > { %1612 = vset.pattern.permute.xlu2 %v1932_v1  ;;  %439 = vperm.xlu1 %1611, %v425_v2   ;;  %p412_p4 = scmp.eq.s32.totalorder %s1905_s27, 1  ;;  %v421_v9 = vld [vmem:[%s2115_s4] sm:$0x3]  ;;  %v2152_v18 = vand.u32 127, %v416_v11 }
  0x47   : > { %429 = vperm.xlu0 %1610, %v423_v3   ;;  %453 = vperm.xlu2 %1612, %v423_v3   ;;  %p2145_p5 = pnand %p510_p3, %p408_p1  ;;  %v468_v10 = vperm.slane %v421_v9, 1  ;;  %v447_v12 = vperm.slane %v421_v9, 0  ;;  %v1618_v13 = vld [vmem:[%s356_s11] ss:$0 sm:$0xff] }
  0x48   : > { %vm420_vm0 = vcmp.lt.s32.totalorder %v2152_v18, 8 }
  0x4e   : > { %444 = vperm.xlu1 %1611, %v426_v4  }
  0x4f   : > { %434 = vperm.xlu0 %1610, %v424_v5   ;;  %457 = vperm.xlu2 %1612, %v424_v5  }
  0x56   : > { %1614 = vset.pattern.permute.xlu1 %v1932_v1 }
  0x57   : > { %1613 = vset.pattern.permute.xlu0 %v1932_v1  ;;  %465 = vperm.xlu1 %1614, %v426_v4  }
  0x58   : > { %461 = vperm.xlu0 %1613, %v425_v2   ;;  %1615 = vset.pattern.permute.xlu2 %v1933_v6 }
  0x59   : > { %478 = vperm.xlu2 %1615, %v423_v3  }
  0x5f   : > { %1616 = vset.pattern.permute.xlu1 %v1933_v6 }
  0x60   : > { %1617 = vset.pattern.permute.xlu0 %v1933_v6  ;;  %482 = vperm.xlu1 %1616, %v424_v5  }
  0x61   : > { %490 = vperm.xlu0 %1617, %v426_v4   ;;  %486 = vperm.xlu2 %1615, %v425_v2  }
  0xa1   : > { %v454_v7 = vpop.permute.xlu2 %453 }
  0xa2   : > { %v469_v15 = vmul.f32 %v468_v10, %v454_v7 }
  0xa9   : > { %v458_v8 = vpop.permute.xlu2 %457 }
  0xaa   : > { %v470_v37 = vmul.f32 %v468_v10, %v458_v8 }
  0xb3   : > { %v479_v14 = vpop.permute.xlu2 %478 }
  0xb4   : > { %v496_v20 = vmul.f32 %v1618_v13, %v479_v14 }
  0xb8   : > { %v440_v16 = vpop.permute.xlu1 %439 }
  0xb9   : > { %v430_v17 = vpop.permute.xlu0 %429  ;;  %v450_v29 = vmul.f32 %v447_v12, %v440_v16 }
  0xba   : > { %v448_v19 = vmul.f32 %v447_v12, %v430_v17 }
  0xbb   : > { %v487_v26 = vpop.permute.xlu2 %486 }
  0xbc   : > { %v473_v21 = vadd.f32 %v469_v15, %v448_v19  ;;  %v498_v31 = vmul.f32 %v1618_v13, %v487_v26 }
  0xbe   : > { %v500_v22 = vadd.f32 %v496_v20, %v473_v21 }
  0xc0   : > { %v2157_v23 = vsel %vm420_vm0, %v500_v22, 0.0  ;;  %v445_v24 = vpop.permute.xlu1 %444 }
  0xc1   : > { %v435_v25 = vpop.permute.xlu0 %434  ;;  %v451_v38 = vmul.f32 %v447_v12, %v445_v24 }
  0xc2   : > { %v449_v34 = vmul.f32 %v447_v12, %v435_v25 }
  0xc4   : > { %v474_v41 = vadd.f32 %v470_v37, %v449_v34 }
  0xc9   : > { %v466_v27 = vpop.permute.xlu1 %465 }
  0xca   : > { %v462_v28 = vpop.permute.xlu0 %461  ;;  %v472_v35 = vmul.f32 %v468_v10, %v466_v27 }
  0xcb   : > { %v471_v30 = vmul.f32 %v468_v10, %v462_v28 }
  0xcc   : > { %v476_v42 = vadd.f32 %v472_v35, %v451_v38 }
  0xcd   : > { %v475_v32 = vadd.f32 %v471_v30, %v450_v29 }
  0xcf   : > { %v502_v33 = vadd.f32 %v498_v31, %v475_v32 }
  0xd1   : > { %v2161_v36 = vsel %vm420_vm0, %v502_v33, 0.0 }
  0xd2   : > { %v483_v39 = vpop.permute.xlu1 %482 }
  0xd3   : > { %v491_v40 = vpop.permute.xlu0 %490  ;;  %v497_v43 = vmul.f32 %v1618_v13, %v483_v39 }
  0xd4   : > { %v499_v44 = vmul.f32 %v1618_v13, %v491_v40  ;;  %514 = sbr.rel (%p2145_p5) target bundleno = 226 (0xe2), region = 72 }
  0xd5   : > { %v501_v45 = vadd.f32 %v497_v43, %v474_v41 }
  0xd6   : > { %v503_v46 = vadd.f32 %v499_v44, %v476_v42 }
  0xd7   : > { %v2165_v47 = vsel %vm420_vm0, %v501_v45, 0.0 }
  0xd8   : > { %v2169_v48 = vsel %vm420_vm0, %v503_v46, 0.0 }
  0xd9   : > { %vm515_vm1 = vcmask 7168   ;;  %v1934_v49 = vmov 0.0  }
  0xda   : > { %516 = vst.msk [vmem:[#allocation2] sm:$0xff] %vm515_vm1, %v1934_v49 }
  0xdb   : > { %517 = vst.msk [vmem:[#allocation2 + $0x8] sm:$0xff] %vm515_vm1, %v1934_v49 }
  0xdc   : > { %518 = vst.msk [vmem:[#allocation2 + $0x10] sm:$0xff] %vm515_vm1, %v1934_v49 }
  0xdd   : > { %519 = vst.msk [vmem:[#allocation2 + $0x18] sm:$0xff] %vm515_vm1, %v1934_v49 }
  0xde   : > { %520 = vst.msk [vmem:[#allocation3] sm:$0xff] %vm515_vm1, %v1934_v49 }
  0xdf   : > { %521 = vst.msk [vmem:[#allocation3 + $0x8] sm:$0xff] %vm515_vm1, %v1934_v49 }
  0xe0   : > { %522 = vst.msk [vmem:[#allocation3 + $0x10] sm:$0xff] %vm515_vm1, %v1934_v49 }
  0xe1   : > { %523 = vst.msk [vmem:[#allocation3 + $0x18] sm:$0xff] %vm515_vm1, %v1934_v49 }
  0xe2 PF: > { %p1440_p6 = scmp.ne.s32.totalorder %s1909_s28, 0 }
  0xe4   : > { %526 = sbr.rel (%p1440_p6) target bundleno = 371 (0x173), region = 76 }
  0xe9   : > { %vm531_vm2 = vcmask 64512   ;;  %v557_v50 = vmul.f32 %v2157_v23, %v2157_v23  ;;  %v558_v54 = vmul.f32 %v2165_v47, %v2165_v47  ;;  %v560_v58 = vmul.f32 %v2169_v48, %v2169_v48  ;;  %v529_v62 = vld [vmem:[#allocation2 + $0x10] sm:$0xff]  ;;  %v527_v63 = vld [vmem:[#allocation2] sm:$0xff]  ;;  %v530_v7 = vld [vmem:[#allocation2 + $0x18] sm:$0xff] }
  0xea   : > { %v538_v51 = vsel %vm531_vm2, %v2161_v36, 0.0  ;;  %v532_v52 = vsel %vm531_vm2, %v2157_v23, 0.0  ;;  %v541_v55 = vsel %vm531_vm2, %v2169_v48, 0.0  ;;  %v535_v56 = vsel %vm531_vm2, %v2165_v47, 0.0  ;;  %v553_v0 = vld [vmem:[#allocation3] sm:$0xff]  ;;  %v528_v8 = vld [vmem:[#allocation2 + $0x8] sm:$0xff] }
  0xeb   : > { %539 = vadd.xlane.f32.xlu1 %v538_v51  ;;  %533 = vadd.xlane.f32.xlu0 %v532_v52  ;;  %v561_v53 = vsel %vm531_vm2, %v557_v50, 0.0  ;;  %v564_v57 = vsel %vm531_vm2, %v558_v54, 0.0  ;;  %v559_v59 = vmul.f32 %v2161_v36, %v2161_v36  ;;  %v570_v60 = vsel %vm531_vm2, %v560_v58, 0.0  ;;  %v554_v9 = vld [vmem:[#allocation3 + $0x8] sm:$0xff]  ;;  %v556_v16 = vld [vmem:[#allocation3 + $0x18] sm:$0xff]  ;;  %v555_v17 = vld [vmem:[#allocation3 + $0x10] sm:$0xff] }
  0xec   : > { %562 = vadd.xlane.f32.xlu2 %v561_v53  ;;  %vm548_vm3 = vcmask 7168  }
  0xed   : > { %v567_v61 = vsel %vm531_vm2, %v559_v59, 0.0 }
  0xf3   : > { %542 = vadd.xlane.f32.xlu1 %v541_v55  ;;  %536 = vadd.xlane.f32.xlu0 %v535_v56 }
  0xf4   : > { %565 = vadd.xlane.f32.xlu2 %v564_v57 }
  0xfb   : > { %571 = vadd.xlane.f32.xlu1 %v570_v60  ;;  %568 = vadd.xlane.f32.xlu0 %v567_v61 }
 0x15e   : > { %v540_v1 = vpop.xlane.xlu1 %539  ;;  %v534_v2 = vpop.xlane.xlu0 %533 }
 0x15f   : > { %v546_v3 = vadd.f32 %v540_v1, %v529_v62  ;;  %v544_v4 = vadd.f32 %v534_v2, %v527_v63  ;;  %v563_v5 = vpop.xlane.xlu2 %562 }
 0x160   : > { %v573_v6 = vadd.f32 %v563_v5, %v553_v0 }
 0x161   : > { %551 = vst.msk [vmem:[#allocation2 + $0x10] sm:$0xff] %vm548_vm3, %v546_v3 }
 0x162   : > { %549 = vst.msk [vmem:[#allocation2] sm:$0xff] %vm548_vm3, %v544_v4 }
 0x163   : > { %577 = vst.msk [vmem:[#allocation3] sm:$0xff] %vm548_vm3, %v573_v6 }
 0x166   : > { %v543_v10 = vpop.xlane.xlu1 %542  ;;  %v537_v11 = vpop.xlane.xlu0 %536 }
 0x167   : > { %v547_v12 = vadd.f32 %v543_v10, %v530_v7  ;;  %v545_v13 = vadd.f32 %v537_v11, %v528_v8  ;;  %v566_v14 = vpop.xlane.xlu2 %565 }
 0x168   : > { %v574_v15 = vadd.f32 %v566_v14, %v554_v9 }
 0x169   : > { %552 = vst.msk [vmem:[#allocation2 + $0x18] sm:$0xff] %vm548_vm3, %v547_v12 }
 0x16a   : > { %550 = vst.msk [vmem:[#allocation2 + $0x8] sm:$0xff] %vm548_vm3, %v545_v13 }
 0x16b   : > { %578 = vst.msk [vmem:[#allocation3 + $0x8] sm:$0xff] %vm548_vm3, %v574_v15 }
 0x16e   : > { %v572_v19 = vpop.xlane.xlu1 %571  ;;  %v569_v20 = vpop.xlane.xlu0 %568 }
 0x16f   : > { %v576_v21 = vadd.f32 %v572_v19, %v556_v16  ;;  %v575_v22 = vadd.f32 %v569_v20, %v555_v17 }
 0x171   : > { %580 = vst.msk [vmem:[#allocation3 + $0x18] sm:$0xff] %vm548_vm3, %v576_v21 }
 0x172   : > { %579 = vst.msk [vmem:[#allocation3 + $0x10] sm:$0xff] %vm548_vm3, %v575_v22 }
 0x173 PF: > { %p581_p7 = scmp.eq.s32.totalorder %s1909_s28, 1 }
 0x175   : > { %p582_p8 = pnand %p581_p7, %p408_p1 }
 0x176   : > { %s1936_s18 = smov (!%p582_p8), 1  }
 0x177   : > { %585 = sbr.rel (%p582_p8) target bundleno = 654 (0x28e), region = 80 }
 0x17c   : > { %v588_v24 = vld [vmem:[#allocation2 + $0x10] sm:$0xff]  ;;  %v586_v28 = vld [vmem:[#allocation2] sm:$0xff]  ;;  %v589_v32 = vld [vmem:[#allocation2 + $0x18] sm:$0xff]  ;;  %v1935_v54 = vmov 0   ;;  %vm686_vm1 = vcmp.eq.s32.totalorder %v2152_v18, 0  ;;  %vm731_vm2 = vcmask 15360  }
 0x17d   : > { %v596_v25 = vld [vmem:[#allocation3 + $0x10] sm:$0xff]  ;;  %v2207_v26 = vmul.f32 0.0625, %v588_v24  ;;  %v594_v29 = vld [vmem:[#allocation3] sm:$0xff]  ;;  %v2209_v30 = vmul.f32 0.0625, %v586_v28  ;;  %v597_v33 = vld [vmem:[#allocation3 + $0x18] sm:$0xff]  ;;  %v2213_v35 = vmul.f32 0.0625, %v589_v32  ;;  %1619 = vset.pattern.permute.xlu2 %v1935_v54  ;;  %1620 = vset.pattern.permute.xlu0 %v1935_v54 }
 0x17e   : > { %v600_v27 = vmul.f32 0.0625, %v596_v25  ;;  %v598_v31 = vmul.f32 0.0625, %v594_v29  ;;  %v601_v37 = vmul.f32 0.0625, %v597_v33  ;;  %v587_v38 = vld [vmem:[#allocation2 + $0x8] sm:$0xff]  ;;  %1621 = vset.pattern.permute.xlu1 %v1935_v54  ;;  %v612_v11 = vld [vmem:[#allocation12 + $0x10] sm:$0xff]  ;;  %v613_v28 = vld [vmem:[#allocation12 + $0x18] sm:$0xff] }
 0x17f   : > { %v604_v34 = vmul.f32 %v2207_v26, %v2207_v26  ;;  %v595_v39 = vld [vmem:[#allocation3 + $0x8] sm:$0xff]  ;;  %v602_v40 = vmul.f32 %v2209_v30, %v2209_v30  ;;  %v2217_v41 = vmul.f32 0.0625, %v587_v38  ;;  %v605_v44 = vmul.f32 %v2213_v35, %v2213_v35 }
 0x180   : > { %v599_v42 = vmul.f32 0.0625, %v595_v39  ;;  %v610_v14 = vld [vmem:[#allocation12] sm:$0xff]  ;;  %v611_v32 = vld [vmem:[#allocation12 + $0x8] sm:$0xff]  ;;  %vm736_vm3 = vcmask 7168  }
 0x181   : > { %v608_v43 = vsub.f32 %v600_v27, %v604_v34  ;;  %v606_v45 = vsub.f32 %v598_v31, %v602_v40  ;;  %v603_v46 = vmul.f32 %v2217_v41, %v2217_v41  ;;  %v609_v50 = vsub.f32 %v601_v37, %v605_v44 }
 0x183   : > { %v616_v49 = vadd.f32 1e-05, %v608_v43  ;;  %v614_v51 = vadd.f32 1e-05, %v606_v45  ;;  %v607_v52 = vsub.f32 %v599_v42, %v603_v46  ;;  %v617_v53 = vadd.f32 1e-05, %v609_v50 }
 0x185   : > { %1625 = vrsqrt.f32 %v616_v49  ;;  %v615_v55 = vadd.f32 1e-05, %v607_v52  ;;  %vm644_vm4 = vweird.f32 %v616_v49  ;;  %vm624_vm6 = vweird.f32 %v614_v51 }
 0x186   : > { %1627 = vrsqrt.f32 %v614_v51  ;;  %vm654_vm8 = vweird.f32 %v617_v53 }
 0x187   : > { %1629 = vrsqrt.f32 %v617_v53  ;;  %vm634_vm11 = vweird.f32 %v615_v55 }
 0x188   : > { %1631 = vrsqrt.f32 %v615_v55 }
 0x18b   : > { %v1626_v56 = vpop.eup %1625 }
 0x18c   : > { %v1628_v57 = vpop.eup %1627  ;;  %v639_v58 = vmul.f32 %v1626_v56, %v616_v49  ;;  %vm645_vm5 = vweird.f32 %v1626_v56 }
 0x18d   : > { %v1630_v59 = vpop.eup %1629  ;;  %v619_v60 = vmul.f32 %v1628_v57, %v614_v51  ;;  %vm625_vm7 = vweird.f32 %v1628_v57  ;;  %vm2223_vm10 = vmor %vm644_vm4, %vm645_vm5 }
 0x18e   : > { %v1632_v61 = vpop.eup %1631  ;;  %v640_v62 = vmul.f32 %v1626_v56, %v639_v58  ;;  %v649_v63 = vmul.f32 %v1630_v59, %v617_v53  ;;  %vm655_vm9 = vweird.f32 %v1630_v59  ;;  %vm626_vm13 = vmor %vm624_vm6, %vm625_vm7  ;;  %v1938_v53 = vmov 0.0  }
 0x18f   : > { %v620_v0 = vmul.f32 %v1628_v57, %v619_v60  ;;  %v629_v1 = vmul.f32 %v1632_v61, %v615_v55  ;;  %vm635_vm12 = vweird.f32 %v1632_v61  ;;  %vm2227_vm14 = vmor %vm654_vm8, %vm655_vm9  ;;  %737 = vst.msk [vmem:[#allocation4] sm:$0xff] %vm736_vm3, %v1938_v53 }
 0x190   : > { %v641_v2 = vmul.f32 0.5, %v640_v62  ;;  %v650_v3 = vmul.f32 %v1630_v59, %v649_v63  ;;  %vm2233_vm15 = vmor %vm634_vm11, %vm635_vm12  ;;  %738 = vst.msk [vmem:[#allocation4 + $0x8] sm:$0xff] %vm736_vm3, %v1938_v53 }
 0x191   : > { %v621_v4 = vmul.f32 0.5, %v620_v0  ;;  %v630_v5 = vmul.f32 %v1632_v61, %v629_v1  ;;  %739 = vst.msk [vmem:[#allocation4 + $0x10] sm:$0xff] %vm736_vm3, %v1938_v53 }
 0x192   : > { %v642_v6 = vsub.f32 1.5, %v641_v2  ;;  %v651_v7 = vmul.f32 0.5, %v650_v3  ;;  %740 = vst.msk [vmem:[#allocation4 + $0x18] sm:$0xff] %vm736_vm3, %v1938_v53 }
 0x193   : > { %v622_v9 = vsub.f32 1.5, %v621_v4  ;;  %v631_v10 = vmul.f32 0.5, %v630_v5  ;;  %741 = vst.msk [vmem:[#allocation4 + $0x20] sm:$0xff] %vm736_vm3, %v1938_v53 }
 0x194   : > { %v643_v12 = vmul.f32 %v1626_v56, %v642_v6  ;;  %v652_v13 = vsub.f32 1.5, %v651_v7  ;;  %742 = vst.msk [vmem:[#allocation4 + $0x28] sm:$0xff] %vm736_vm3, %v1938_v53 }
 0x195   : > { %v623_v15 = vmul.f32 %v1628_v57, %v622_v9  ;;  %v632_v17 = vsub.f32 1.5, %v631_v10  ;;  %743 = vst.msk [vmem:[#allocation4 + $0x30] sm:$0xff] %vm736_vm3, %v1938_v53 }
 0x196   : > { %v647_v19 = vsel %vm2223_vm10, %v1626_v56, %v643_v12  ;;  %v653_v20 = vmul.f32 %v1630_v59, %v652_v13  ;;  %744 = vst.msk [vmem:[#allocation4 + $0x38] sm:$0xff] %vm736_vm3, %v1938_v53 }
 0x197   : > { %v660_v22 = vmul.f32 %v647_v19, %v612_v11  ;;  %v627_v24 = vsel %vm626_vm13, %v1628_v57, %v623_v15  ;;  %v633_v25 = vmul.f32 %v1632_v61, %v632_v17  ;;  %745 = vst.msk [vmem:[#allocation5] sm:$0xff] %vm736_vm3, %v1938_v53 }
 0x198   : > { %v658_v27 = vmul.f32 %v627_v24, %v610_v14  ;;  %v657_v29 = vsel %vm2227_vm14, %v1630_v59, %v653_v20  ;;  %746 = vst.msk [vmem:[#allocation5 + $0x8] sm:$0xff] %vm736_vm3, %v1938_v53 }
 0x199   : > { %v664_v31 = vmul.f32 %v660_v22, %v2207_v26  ;;  %v637_v33 = vsel %vm2233_vm15, %v1632_v61, %v633_v25  ;;  %v661_v37 = vmul.f32 %v657_v29, %v613_v28  ;;  %v1937_v26 = vmov 1   ;;  %747 = vst.msk [vmem:[#allocation5 + $0x10] sm:$0xff] %vm736_vm3, %v1938_v53 }
 0x19a   : > { %v662_v34 = vmul.f32 %v658_v27, %v2209_v30  ;;  %689 = vperm.xlu2 %1619, %v658_v27   ;;  %v659_v38 = vmul.f32 %v637_v33, %v611_v32  ;;  %748 = vst.msk [vmem:[#allocation5 + $0x18] sm:$0xff] %vm736_vm3, %v1938_v53 }
 0x19b   : > { %674 = vrot.lane.b32.xlu1 %v664_v31, %s1936_s18  ;;  %v665_v39 = vmul.f32 %v661_v37, %v2213_v35  ;;  %749 = vst.msk [vmem:[#allocation5 + $0x20] sm:$0xff] %vm736_vm3, %v1938_v53 }
 0x19c   : > { %670 = vrot.lane.b32.xlu0 %v662_v34, %s1936_s18  ;;  %v663_v40 = vmul.f32 %v659_v38, %v2217_v41  ;;  %750 = vst.msk [vmem:[#allocation5 + $0x28] sm:$0xff] %vm736_vm3, %v1938_v53 }
 0x19d   : > { %751 = vst.msk [vmem:[#allocation5 + $0x30] sm:$0xff] %vm736_vm3, %v1938_v53 }
 0x19e   : > { %752 = vst.msk [vmem:[#allocation5 + $0x38] sm:$0xff] %vm736_vm3, %v1938_v53 }
 0x1a2   : > { %694 = vperm.xlu2 %1619, %v659_v38  }
 0x1a3   : > { %676 = vrot.lane.b32.xlu1 %v665_v39, %s1936_s18 }
 0x1a4   : > { %672 = vrot.lane.b32.xlu0 %v663_v40, %s1936_s18 }
 0x1aa   : > { %1622 = vset.pattern.permute.xlu2 %v1937_v26 }
 0x1ab   : > { %704 = vperm.xlu1 %1621, %v661_v37  }
 0x1ac   : > { %699 = vperm.xlu0 %1620, %v660_v22  }
 0x1b3   : > { %1623 = vset.pattern.permute.xlu1 %v1937_v26 }
 0x1b4   : > { %1624 = vset.pattern.permute.xlu0 %v1937_v26 }
 0x1f4   : > { %v690_v41 = vpop.permute.xlu2 %689 }
 0x1fc   : > { %v695_v50 = vpop.permute.xlu2 %694 }
 0x20d   : > { %v675_v30 = vpop.permute.xlu1 %674 }
 0x20e   : > { %v671_v42 = vpop.permute.xlu0 %670  ;;  %v684_v49 = vsub.f32 %v612_v11, %v675_v30 }
 0x20f   : > { %v682_v43 = vsub.f32 %v610_v14, %v671_v42 }
 0x211   : > { %709 = vperm.xlu2 %1622, %v682_v43  }
 0x215   : > { %v677_v44 = vpop.permute.xlu1 %676 }
 0x216   : > { %v685_v45 = vsub.f32 %v613_v28, %v677_v44  ;;  %v673_v46 = vpop.permute.xlu0 %672 }
 0x217   : > { %v683_v35 = vsub.f32 %v611_v32, %v673_v46 }
 0x218   : > { %724 = vperm.xlu0 %1624, %v685_v45  }
 0x219   : > { %719 = vperm.xlu2 %1622, %v684_v49   ;;  %714 = vperm.xlu1 %1623, %v683_v35  }
 0x21d   : > { %v705_v57 = vpop.permute.xlu1 %704 }
 0x21e   : > { %v700_v54 = vpop.permute.xlu0 %699 }
 0x26b   : > { %v710_v51 = vpop.permute.xlu2 %709 }
 0x26c   : > { %v727_v52 = vsel %vm686_vm1, %v690_v41, %v710_v51 }
 0x26d   : > { %732 = vst.msk [vmem:[#allocation6] sm:$0xff] %vm731_vm2, %v727_v52 }
 0x273   : > { %v720_v55 = vpop.permute.xlu2 %719 }
 0x274   : > { %v729_v56 = vsel %vm686_vm1, %v700_v54, %v720_v55 }
 0x275   : > { %734 = vst.msk [vmem:[#allocation6 + $0x10] sm:$0xff] %vm731_vm2, %v729_v56 }
 0x28a   : > { %v725_v58 = vpop.permute.xlu0 %724 }
 0x28b   : > { %v715_v59 = vpop.permute.xlu1 %714  ;;  %v730_v60 = vsel %vm686_vm1, %v705_v57, %v725_v58 }
 0x28c   : > { %v728_v61 = vsel %vm686_vm1, %v695_v50, %v715_v59  ;;  %735 = vst.msk [vmem:[#allocation6 + $0x18] sm:$0xff] %vm731_vm2, %v730_v60 }
 0x28d   : > { %733 = vst.msk [vmem:[#allocation6 + $0x8] sm:$0xff] %vm731_vm2, %v728_v61 }
 0x28e PF: > { %p1441_p9 = scmp.ne.s32.totalorder %s1909_s28, 1 }
 0x290   : > { %755 = sbr.rel (%p1441_p9) target bundleno = 1099 (0x44b), region = 84 }
 0x295   : > { %v758_v62 = vld [vmem:[#allocation6 + $0x10] sm:$0xff]  ;;  %v1939_v63 = vmov 1   ;;  %v1940_v0 = vmov 0   ;;  %v756_v1 = vld [vmem:[#allocation6] sm:$0xff]  ;;  %v759_v2 = vld [vmem:[#allocation6 + $0x18] sm:$0xff]  ;;  %vm838_vm4 = vcmask 261120  }
 0x296   : > { %1634 = vset.pattern.permute.xlu1 %v1939_v63  ;;  %1633 = vset.pattern.permute.xlu0 %v1940_v0  ;;  %v757_v3 = vld [vmem:[#allocation6 + $0x8] sm:$0xff]  ;;  %v1469_v29 = vld [vmem:[#allocation14 + $0x18] sm:$0xff]  ;;  %vm896_vm5 = vcmask 64512  }
 0x297   : > { %793 = vperm.xlu1 %1634, %v758_v62   ;;  %772 = vperm.xlu0 %1633, %v758_v62   ;;  %v1466_v27 = vld [vmem:[#allocation14] sm:$0xff]  ;;  %v1467_v28 = vld [vmem:[#allocation14 + $0x8] sm:$0xff] }
 0x298   : > { %1635 = vset.pattern.permute.xlu2 %v1940_v0 }
 0x299   : > { %762 = vperm.xlu2 %1635, %v756_v1  }
 0x29f   : > { %797 = vperm.xlu1 %1634, %v759_v2   ;;  %777 = vperm.xlu0 %1633, %v759_v2  }
 0x2a1   : > { %767 = vperm.xlu2 %1635, %v757_v3  }
 0x2a7   : > { %1636 = vset.pattern.permute.xlu0 %v1939_v63  ;;  %789 = vperm.xlu1 %1634, %v757_v3  }
 0x2a8   : > { %785 = vperm.xlu0 %1636, %v756_v1  }
 0x2f3   : > { %v763_v6 = vpop.permute.xlu2 %762 }
 0x2f4   : > { %v780_v19 = vmul.f32 %v763_v6, %v2157_v23 }
 0x2fb   : > { %v768_v13 = vpop.permute.xlu2 %767 }
 0x2fc   : > { %v781_v16 = vmul.f32 %v768_v13, %v2165_v47  ;;  %v1468_v47 = vld [vmem:[#allocation14 + $0x10] sm:$0xff] }
 0x309   : > { %v794_v4 = vpop.permute.xlu1 %793  ;;  %v773_v5 = vpop.permute.xlu0 %772 }
 0x30a   : > { %v782_v7 = vmul.f32 %v773_v5, %v2161_v36 }
 0x30c   : > { %v802_v10 = vadd.f32 %v794_v4, %v782_v7  ;;  %v890_v7 = vld [vmem:[#allocation4 + $0x10] sm:$0xff] }
 0x30e   : > { %v806_v14 = vmax.f32 %v802_v10, 0.0 }
 0x311   : > { %v798_v8 = vpop.permute.xlu1 %797  ;;  %v778_v9 = vpop.permute.xlu0 %777 }
 0x312   : > { %v783_v11 = vmul.f32 %v778_v9, %v2169_v48 }
 0x314   : > { %v803_v12 = vadd.f32 %v798_v8, %v783_v11  ;;  %v888_v8 = vld [vmem:[#allocation4] sm:$0xff] }
 0x315   : > { %v938_v11 = vld [vmem:[#allocation5] sm:$0xff] }
 0x316   : > { %v807_v15 = vmax.f32 %v803_v12, 0.0 }
 0x318   : > { %v817_v17 = vpack.c.bf16 %v807_v15, %v806_v14 }
 0x319   : > { %v790_v20 = vpop.permute.xlu1 %789 }
 0x31a   : > { %v801_v21 = vadd.f32 %v790_v20, %v781_v16  ;;  %857 = vmatpush.bf16.msra.mxu0 %v817_v17  ;;  %1470 = vmatpush.bf16.msra.mxu1 %v817_v17  ;;  %v786_v22 = vpop.permute.xlu0 %785  ;;  %v940_v16 = vld [vmem:[#allocation5 + $0x10] sm:$0xff] }
 0x31b   : > { %1471 = vmatpush.bf16.msra.mxu2 %v817_v17  ;;  %1472 = vmatpush.bf16.msra.mxu3 %v817_v17  ;;  %v800_v36 = vadd.f32 %v786_v22, %v780_v19  ;;  %v892_v17 = vld [vmem:[#allocation4 + $0x20] sm:$0xff] }
 0x31c   : > { %v805_v24 = vmax.f32 %v801_v21, 0.0  ;;  %v889_v21 = vld [vmem:[#allocation4 + $0x8] sm:$0xff] }
 0x31d   : > { %v804_v25 = vmax.f32 %v800_v36, 0.0 }
 0x31f   : > { %v816_v48 = vpack.c.bf16 %v805_v24, %v804_v25 }
 0x321   : > { %858 = vmatpush.bf16.msra.mxu0 %v816_v48  ;;  %1473 = vmatpush.bf16.msra.mxu1 %v816_v48 }
 0x322   : > { %1474 = vmatpush.bf16.msra.mxu2 %v816_v48  ;;  %1475 = vmatpush.bf16.msra.mxu3 %v816_v48  ;;  %v895_v48 = vld [vmem:[#allocation4 + $0x38] sm:$0xff] }
 0x324   : > { %1458 = vmatmul.msk.bf16.vlgmr.msra.gmra.mxu0 %vm838_vm4, %v1466_v27  ;;  %1459 = vmatmul.msk.bf16.vlgmr.msra.gmra.mxu1 %vm838_vm4, %v1467_v28  ;;  %v894_v27 = vld [vmem:[#allocation4 + $0x30] sm:$0xff] }
 0x325   : > { %1460 = vmatmul.msk.bf16.vlgmr.msra.gmra.mxu2 %vm838_vm4, %v1468_v47  ;;  %1461 = vmatmul.msk.bf16.vlgmr.msra.gmra.mxu3 %vm838_vm4, %v1469_v29  ;;  %v941_v29 = vld [vmem:[#allocation5 + $0x18] sm:$0xff] }
 0x3a1   : > { %v860_v23 = vpop.f32.mrf.mxu0  ;;  %v865_v31 = vpop.f32.mrf.mxu1 }
 0x3a2   : > { %v880_v32 = vsel %vm420_vm0, %v860_v23, 0.0  ;;  %v882_v33 = vsel %vm420_vm0, %v865_v31, 0.0 }
 0x3a3   : > { %v946_v34 = vmul.f32 %v880_v32, %v880_v32  ;;  %v903_v37 = vsel %vm896_vm5, %v882_v33, 0.0  ;;  %v897_v38 = vsel %vm896_vm5, %v880_v32, 0.0  ;;  %v948_v39 = vmul.f32 %v882_v33, %v882_v33 }
 0x3a4   : > { %904 = vadd.xlane.f32.xlu0 %v903_v37  ;;  %898 = vadd.xlane.f32.xlu2 %v897_v38  ;;  %v891_v37 = vld [vmem:[#allocation4 + $0x18] sm:$0xff] }
 0x3a5   : > { %v954_v40 = vsel %vm896_vm5, %v946_v34, 0.0  ;;  %v960_v44 = vsel %vm896_vm5, %v948_v39, 0.0  ;;  %v943_v34 = vld [vmem:[#allocation5 + $0x28] sm:$0xff] }
 0x3a6   : > { %955 = vadd.xlane.f32.xlu1 %v954_v40  ;;  %v893_v40 = vld [vmem:[#allocation4 + $0x28] sm:$0xff] }
 0x3a8   : > { %v870_v26 = vpop.f32.mrf.mxu2  ;;  %v875_v30 = vpop.f32.mrf.mxu3 }
 0x3a9   : > { %v884_v42 = vsel %vm420_vm0, %v870_v26, 0.0  ;;  %v862_v43 = vpop.f32.mrf.mxu0  ;;  %v867_v45 = vpop.f32.mrf.mxu1  ;;  %v886_v50 = vsel %vm420_vm0, %v875_v30, 0.0 }
 0x3aa   : > { %v881_v46 = vsel %vm420_vm0, %v862_v43, 0.0  ;;  %v909_v49 = vsel %vm896_vm5, %v884_v42, 0.0  ;;  %v883_v35 = vsel %vm420_vm0, %v867_v45, 0.0  ;;  %v915_v55 = vsel %vm896_vm5, %v886_v50, 0.0 }
 0x3ab   : > { %v900_v41 = vsel %vm896_vm5, %v881_v46, 0.0  ;;  %v949_v51 = vmul.f32 %v883_v35, %v883_v35  ;;  %v906_v61 = vsel %vm896_vm5, %v883_v35, 0.0  ;;  %v950_v63 = vmul.f32 %v884_v42, %v884_v42 }
 0x3ac   : > { %961 = vadd.xlane.f32.xlu0 %v960_v44  ;;  %910 = vadd.xlane.f32.xlu2 %v909_v49  ;;  %v952_v0 = vmul.f32 %v886_v50, %v886_v50  ;;  %v947_v3 = vmul.f32 %v881_v46, %v881_v46  ;;  %v942_v44 = vld [vmem:[#allocation5 + $0x20] sm:$0xff]  ;;  %v944_v46 = vld [vmem:[#allocation5 + $0x30] sm:$0xff]  ;;  %v939_v50 = vld [vmem:[#allocation5 + $0x8] sm:$0xff] }
 0x3ad   : > { %v963_v57 = vsel %vm896_vm5, %v949_v51, 0.0  ;;  %v966_v1 = vsel %vm896_vm5, %v950_v63, 0.0 }
 0x3ae   : > { %901 = vadd.xlane.f32.xlu1 %v900_v41  ;;  %v972_v2 = vsel %vm896_vm5, %v952_v0, 0.0  ;;  %v957_v4 = vsel %vm896_vm5, %v947_v3, 0.0 }
 0x3b0   : > { %v877_v52 = vpop.f32.mrf.mxu3  ;;  %v872_v53 = vpop.f32.mrf.mxu2 }
 0x3b1   : > { %v887_v54 = vsel %vm420_vm0, %v877_v52, 0.0  ;;  %v885_v58 = vsel %vm420_vm0, %v872_v53, 0.0  ;;  %vm929_vm0 = vcmask 7168   ;;  %v945_v53 = vld [vmem:[#allocation5 + $0x38] sm:$0xff] }
 0x3b2   : > { %v918_v56 = vsel %vm896_vm5, %v887_v54, 0.0  ;;  %v951_v59 = vmul.f32 %v885_v58, %v885_v58  ;;  %v912_v62 = vsel %vm896_vm5, %v885_v58, 0.0  ;;  %v953_v5 = vmul.f32 %v887_v54, %v887_v54 }
 0x3b4   : > { %919 = vadd.xlane.f32.xlu0 %v918_v56  ;;  %916 = vadd.xlane.f32.xlu2 %v915_v55  ;;  %v969_v60 = vsel %vm896_vm5, %v951_v59, 0.0  ;;  %v975_v6 = vsel %vm896_vm5, %v953_v5, 0.0 }
 0x3b6   : > { %964 = vadd.xlane.f32.xlu1 %v963_v57 }
 0x3bc   : > { %970 = vadd.xlane.f32.xlu0 %v969_v60  ;;  %907 = vadd.xlane.f32.xlu2 %v906_v61 }
 0x3be   : > { %913 = vadd.xlane.f32.xlu1 %v912_v62 }
 0x3c4   : > { %967 = vadd.xlane.f32.xlu2 %v966_v1 }
 0x3c6   : > { %973 = vadd.xlane.f32.xlu1 %v972_v2 }
 0x3cc   : > { %958 = vadd.xlane.f32.xlu2 %v957_v4 }
 0x3d4   : > { %976 = vadd.xlane.f32.xlu2 %v975_v6 }
 0x417   : > { %v905_v9 = vpop.xlane.xlu0 %904  ;;  %v899_v10 = vpop.xlane.xlu2 %898 }
 0x418   : > { %v923_v12 = vadd.f32 %v905_v9, %v890_v7  ;;  %v921_v13 = vadd.f32 %v899_v10, %v888_v8 }
 0x419   : > { %v956_v14 = vpop.xlane.xlu1 %955 }
 0x41a   : > { %932 = vst.msk [vmem:[#allocation4 + $0x10] sm:$0xff] %vm929_vm0, %v923_v12  ;;  %v978_v15 = vadd.f32 %v956_v14, %v938_v11 }
 0x41b   : > { %930 = vst.msk [vmem:[#allocation4] sm:$0xff] %vm929_vm0, %v921_v13 }
 0x41c   : > { %986 = vst.msk [vmem:[#allocation5] sm:$0xff] %vm929_vm0, %v978_v15 }
 0x41f   : > { %v962_v19 = vpop.xlane.xlu0 %961  ;;  %v911_v20 = vpop.xlane.xlu2 %910 }
 0x420   : > { %v980_v22 = vadd.f32 %v962_v19, %v940_v16  ;;  %v925_v36 = vadd.f32 %v911_v20, %v892_v17 }
 0x421   : > { %v902_v24 = vpop.xlane.xlu1 %901 }
 0x422   : > { %988 = vst.msk [vmem:[#allocation5 + $0x10] sm:$0xff] %vm929_vm0, %v980_v22  ;;  %v922_v25 = vadd.f32 %v902_v24, %v889_v21 }
 0x423   : > { %934 = vst.msk [vmem:[#allocation4 + $0x20] sm:$0xff] %vm929_vm0, %v925_v36 }
 0x424   : > { %931 = vst.msk [vmem:[#allocation4 + $0x8] sm:$0xff] %vm929_vm0, %v922_v25 }
 0x427   : > { %v920_v28 = vpop.xlane.xlu0 %919  ;;  %v917_v47 = vpop.xlane.xlu2 %916 }
 0x428   : > { %v928_v23 = vadd.f32 %v920_v28, %v895_v48  ;;  %v927_v31 = vadd.f32 %v917_v47, %v894_v27 }
 0x429   : > { %v965_v32 = vpop.xlane.xlu1 %964 }
 0x42a   : > { %937 = vst.msk [vmem:[#allocation4 + $0x38] sm:$0xff] %vm929_vm0, %v928_v23  ;;  %v981_v33 = vadd.f32 %v965_v32, %v941_v29 }
 0x42b   : > { %936 = vst.msk [vmem:[#allocation4 + $0x30] sm:$0xff] %vm929_vm0, %v927_v31 }
 0x42c   : > { %989 = vst.msk [vmem:[#allocation5 + $0x18] sm:$0xff] %vm929_vm0, %v981_v33 }
 0x42f   : > { %v971_v38 = vpop.xlane.xlu0 %970  ;;  %v908_v39 = vpop.xlane.xlu2 %907 }
 0x430   : > { %v983_v26 = vadd.f32 %v971_v38, %v943_v34  ;;  %v924_v30 = vadd.f32 %v908_v39, %v891_v37 }
 0x431   : > { %v914_v42 = vpop.xlane.xlu1 %913 }
 0x432   : > { %991 = vst.msk [vmem:[#allocation5 + $0x28] sm:$0xff] %vm929_vm0, %v983_v26  ;;  %v926_v43 = vadd.f32 %v914_v42, %v893_v40 }
 0x433   : > { %933 = vst.msk [vmem:[#allocation4 + $0x18] sm:$0xff] %vm929_vm0, %v924_v30 }
 0x434   : > { %935 = vst.msk [vmem:[#allocation4 + $0x28] sm:$0xff] %vm929_vm0, %v926_v43 }
 0x437   : > { %v968_v45 = vpop.xlane.xlu2 %967 }
 0x438   : > { %v982_v49 = vadd.f32 %v968_v45, %v942_v44 }
 0x439   : > { %v974_v35 = vpop.xlane.xlu1 %973 }
 0x43a   : > { %990 = vst.msk [vmem:[#allocation5 + $0x20] sm:$0xff] %vm929_vm0, %v982_v49  ;;  %v984_v41 = vadd.f32 %v974_v35, %v944_v46 }
 0x43c   : > { %992 = vst.msk [vmem:[#allocation5 + $0x30] sm:$0xff] %vm929_vm0, %v984_v41 }
 0x43f   : > { %v959_v51 = vpop.xlane.xlu2 %958 }
 0x440   : > { %v979_v52 = vadd.f32 %v959_v51, %v939_v50 }
 0x442   : > { %987 = vst.msk [vmem:[#allocation5 + $0x8] sm:$0xff] %vm929_vm0, %v979_v52 }
 0x447   : > { %v977_v54 = vpop.xlane.xlu2 %976 }
 0x448   : > { %v985_v55 = vadd.f32 %v977_v54, %v945_v53 }
 0x44a   : > { %993 = vst.msk [vmem:[#allocation5 + $0x38] sm:$0xff] %vm929_vm0, %v985_v55 }
 0x44b PF: > { %p994_p10 = pnand %p581_p7, %p412_p4 }
 0x44c   : > { %s1942_s27 = smov (!%p994_p10), 1  }
 0x44d   : > { %997 = sbr.rel (%p994_p10) target bundleno = 1388 (0x56c), region = 88 }
 0x452   : > { %v1000_v56 = vld [vmem:[#allocation4 + $0x10] sm:$0xff]  ;;  %v998_v60 = vld [vmem:[#allocation4] sm:$0xff]  ;;  %v1001_v0 = vld [vmem:[#allocation4 + $0x18] sm:$0xff]  ;;  %v1941_v53 = vmov 0  }
 0x453   : > { %v1016_v57 = vld [vmem:[#allocation5 + $0x10] sm:$0xff]  ;;  %v2331_v58 = vmul.f32 0.0625, %v1000_v56  ;;  %v1014_v61 = vld [vmem:[#allocation5] sm:$0xff]  ;;  %v2333_v62 = vmul.f32 0.0625, %v998_v60  ;;  %v1017_v1 = vld [vmem:[#allocation5 + $0x18] sm:$0xff]  ;;  %v2337_v3 = vmul.f32 0.0625, %v1001_v0  ;;  %1639 = vset.pattern.permute.xlu1 %v1941_v53  ;;  %1637 = vset.pattern.permute.xlu2 %v1941_v53 }
 0x454   : > { %v1024_v59 = vmul.f32 0.0625, %v1016_v57  ;;  %v1022_v63 = vmul.f32 0.0625, %v1014_v61  ;;  %v1025_v4 = vmul.f32 0.0625, %v1017_v1  ;;  %v999_v5 = vld [vmem:[#allocation4 + $0x8] sm:$0xff]  ;;  %v1005_v10 = vld [vmem:[#allocation4 + $0x38] sm:$0xff]  ;;  %v1004_v12 = vld [vmem:[#allocation4 + $0x30] sm:$0xff]  ;;  %1638 = vset.pattern.permute.xlu0 %v1941_v53 }
 0x455   : > { %v1032_v2 = vmul.f32 %v2331_v58, %v2331_v58  ;;  %v1015_v6 = vld [vmem:[#allocation5 + $0x8] sm:$0xff]  ;;  %v1030_v7 = vmul.f32 %v2333_v62, %v2333_v62  ;;  %v2341_v8 = vmul.f32 0.0625, %v999_v5  ;;  %v1021_v11 = vld [vmem:[#allocation5 + $0x38] sm:$0xff]  ;;  %v1033_v14 = vmul.f32 %v2337_v3, %v2337_v3  ;;  %v1020_v17 = vld [vmem:[#allocation5 + $0x30] sm:$0xff] }
 0x456   : > { %v1023_v9 = vmul.f32 0.0625, %v1015_v6  ;;  %v2345_v15 = vmul.f32 0.0625, %v1005_v10  ;;  %v1029_v16 = vmul.f32 0.0625, %v1021_v11  ;;  %v1002_v19 = vld [vmem:[#allocation4 + $0x20] sm:$0xff]  ;;  %v2349_v22 = vmul.f32 0.0625, %v1004_v12  ;;  %v1003_v34 = vld [vmem:[#allocation4 + $0x28] sm:$0xff] }
 0x457   : > { %v1040_v13 = vsub.f32 %v1024_v59, %v1032_v2  ;;  %v1038_v20 = vsub.f32 %v1022_v63, %v1030_v7  ;;  %v1031_v21 = vmul.f32 %v2341_v8, %v2341_v8  ;;  %v1028_v36 = vmul.f32 0.0625, %v1020_v17  ;;  %v1018_v24 = vld [vmem:[#allocation5 + $0x20] sm:$0xff]  ;;  %v1019_v26 = vld [vmem:[#allocation5 + $0x28] sm:$0xff]  ;;  %v2427_v17 = vld [vmem:[#allocation15 + $0x10] sm:$0xff] }
 0x458   : > { %v1041_v48 = vsub.f32 %v1025_v4, %v1033_v14  ;;  %v1037_v27 = vmul.f32 %v2345_v15, %v2345_v15  ;;  %v2355_v28 = vmul.f32 0.0625, %v1002_v19  ;;  %v1036_v23 = vmul.f32 %v2349_v22, %v2349_v22 }
 0x459   : > { %v2351_v25 = vadd.f32 1e-05, %v1040_v13  ;;  %v2357_v47 = vadd.f32 1e-05, %v1038_v20  ;;  %v1039_v29 = vsub.f32 %v1023_v9, %v1031_v21  ;;  %v1026_v33 = vmul.f32 0.0625, %v1018_v24 }
 0x45a   : > { %v2362_v31 = vadd.f32 1e-05, %v1041_v48  ;;  %v1045_v32 = vsub.f32 %v1029_v16, %v1037_v27  ;;  %v1044_v38 = vsub.f32 %v1028_v36, %v1036_v23  ;;  %v1034_v40 = vmul.f32 %v2355_v28, %v2355_v28  ;;  %v1199_v27 = vld [vmem:[#allocation6 + $0x8] sm:$0xff] }
 0x45b   : > { %1643 = vrsqrt.f32 %v2351_v25  ;;  %v2365_v37 = vadd.f32 1e-05, %v1039_v29  ;;  %v2375_v42 = vmul.f32 0.0625, %v1003_v34  ;;  %v1027_v44 = vmul.f32 0.0625, %v1019_v26 }
 0x45c   : > { %1645 = vrsqrt.f32 %v2357_v47  ;;  %v2368_v39 = vadd.f32 1e-05, %v1045_v32  ;;  %v2373_v30 = vadd.f32 1e-05, %v1044_v38  ;;  %v1042_v43 = vsub.f32 %v1026_v33, %v1034_v40 }
 0x45d   : > { %1647 = vrsqrt.f32 %v2362_v31  ;;  %v1035_v45 = vmul.f32 %v2375_v42, %v2375_v42  ;;  %vm1088_vm6 = vweird.f32 %v2351_v25  ;;  %vm1068_vm7 = vweird.f32 %v2357_v47 }
 0x45e   : > { %1649 = vrsqrt.f32 %v2365_v37  ;;  %v2381_v49 = vadd.f32 1e-05, %v1042_v43  ;;  %vm1098_vm8 = vweird.f32 %v2362_v31  ;;  %vm1078_vm10 = vweird.f32 %v2365_v37 }
 0x45f   : > { %1651 = vrsqrt.f32 %v2368_v39  ;;  %v1043_v50 = vsub.f32 %v1027_v44, %v1035_v45  ;;  %vm1138_vm5 = vweird.f32 %v2368_v39 }
 0x460   : > { %1653 = vrsqrt.f32 %v2373_v30  ;;  %vm1108_vm3 = vweird.f32 %v2381_v49 }
 0x461   : > { %v1644_v46 = vpop.eup %1643  ;;  %1655 = vrsqrt.f32 %v2381_v49  ;;  %v2398_v57 = vadd.f32 1e-05, %v1043_v50  ;;  %v2473_v50 = vld [vmem:[#allocation15 + $0x8] sm:$0xff] }
 0x462   : > { %v2383_v35 = vpop.eup %1645  ;;  %v1083_v41 = vmul.f32 %v1644_v46, %v2351_v25  ;;  %vm1089_vm9 = vweird.f32 %v1644_v46  ;;  %v2438_v25 = vld [vmem:[#allocation15] sm:$0xff] }
 0x463   : > { %v2386_v51 = vpop.eup %1647  ;;  %v1063_v52 = vmul.f32 %v2383_v35, %v2357_v47  ;;  %vm1069_vm11 = vweird.f32 %v2383_v35  ;;  %1657 = vrsqrt.f32 %v2398_v57  ;;  %vm2421_vm13 = vmor %vm1088_vm6, %vm1089_vm9  ;;  %vm1128_vm6 = vweird.f32 %v2373_v30 }
 0x464   : > { %v2393_v54 = vpop.eup %1649  ;;  %v1084_v55 = vmul.f32 %v1644_v46, %v1083_v41  ;;  %v1093_v56 = vmul.f32 %v2386_v51, %v2362_v31  ;;  %vm1099_vm12 = vweird.f32 %v2386_v51  ;;  %vm2433_vm15 = vmor %vm1068_vm7, %vm1069_vm11  ;;  %vm1118_vm11 = vweird.f32 %v2398_v57 }
 0x465   : > { %v2400_v59 = vpop.eup %1651  ;;  %v1064_v60 = vmul.f32 %v2383_v35, %v1063_v52  ;;  %v1073_v61 = vmul.f32 %v2393_v54, %v2365_v37  ;;  %vm1079_vm14 = vweird.f32 %v2393_v54  ;;  %vm2445_vm1 = vmor %vm1098_vm8, %vm1099_vm12  ;;  %v2467_v37 = vld [vmem:[#allocation15 + $0x18] sm:$0xff] }
 0x466   : > { %v2406_v63 = vpop.eup %1653  ;;  %v1085_v0 = vmul.f32 0.5, %v1084_v55  ;;  %v1094_v1 = vmul.f32 %v2386_v51, %v1093_v56  ;;  %v1133_v2 = vmul.f32 %v2400_v59, %v2368_v39  ;;  %vm2456_vm2 = vmor %vm1078_vm10, %vm1079_vm14  ;;  %vm1139_vm0 = vweird.f32 %v2400_v59  ;;  %v2492_v56 = vld [vmem:[#allocation15 + $0x20] sm:$0xff] }
 0x467   : > { %v1065_v4 = vmul.f32 0.5, %v1064_v60  ;;  %v1074_v5 = vmul.f32 %v2393_v54, %v1073_v61  ;;  %v1123_v6 = vmul.f32 %v2406_v63, %v2373_v30  ;;  %v1656_v11 = vpop.eup %1655  ;;  %vm1129_vm7 = vweird.f32 %v2406_v63  ;;  %vm2496_vm9 = vmor %vm1138_vm5, %vm1139_vm0 }
 0x468   : > { %v1086_v7 = vsub.f32 1.5, %v1085_v0  ;;  %v1095_v9 = vmul.f32 0.5, %v1094_v1  ;;  %v1134_v10 = vmul.f32 %v2400_v59, %v1133_v2  ;;  %v1103_v24 = vmul.f32 %v1656_v11, %v2381_v49  ;;  %vm2501_vm10 = vmor %vm1128_vm6, %vm1129_vm7 }
 0x469   : > { %v1066_v13 = vsub.f32 1.5, %v1065_v4  ;;  %v1075_v14 = vmul.f32 0.5, %v1074_v5  ;;  %v1124_v16 = vmul.f32 %v2406_v63, %v1123_v6  ;;  %vm1109_vm4 = vweird.f32 %v1656_v11  ;;  %v1658_v26 = vpop.eup %1657  ;;  %v2509_v6 = vld [vmem:[#allocation15 + $0x38] sm:$0xff] }
 0x46a   : > { %v1087_v19 = vmul.f32 %v1644_v46, %v1086_v7  ;;  %v1096_v21 = vsub.f32 1.5, %v1095_v9  ;;  %v1135_v36 = vmul.f32 0.5, %v1134_v10  ;;  %v1104_v31 = vmul.f32 %v1656_v11, %v1103_v24  ;;  %vm1110_vm8 = vmor %vm1108_vm3, %vm1109_vm4  ;;  %v2514_v9 = vld [vmem:[#allocation15 + $0x30] sm:$0xff] }
 0x46b   : > { %v1067_v48 = vmul.f32 %v2383_v35, %v1066_v13  ;;  %v1076_v47 = vsub.f32 1.5, %v1075_v14  ;;  %v1125_v29 = vmul.f32 0.5, %v1124_v16  ;;  %vm1119_vm12 = vweird.f32 %v1658_v26 }
 0x46c   : > { %v1091_v23 = vsel %vm2421_vm13, %v1644_v46, %v1087_v19  ;;  %v1097_v32 = vmul.f32 %v2386_v51, %v1096_v21  ;;  %v1136_v45 = vsub.f32 1.5, %v1135_v36  ;;  %v1105_v46 = vmul.f32 0.5, %v1104_v31  ;;  %vm1120_vm13 = vmor %vm1118_vm11, %vm1119_vm12 }
 0x46d   : > { %v1144_v34 = vmul.f32 %v1091_v23, %v2427_v17  ;;  %v1071_v38 = vsel %vm2433_vm15, %v2383_v35, %v1067_v48  ;;  %v1077_v40 = vmul.f32 %v2393_v54, %v1076_v47  ;;  %v1126_v52 = vsub.f32 1.5, %v1125_v29  ;;  %v1198_v48 = vld [vmem:[#allocation6] sm:$0xff]  ;;  %v1200_v47 = vld [vmem:[#allocation6 + $0x10] sm:$0xff] }
 0x46e   : > { %v1142_v43 = vmul.f32 %v1071_v38, %v2438_v25  ;;  %v1101_v44 = vsel %vm2445_vm1, %v2386_v51, %v1097_v32  ;;  %v1106_v55 = vsub.f32 1.5, %v1105_v46  ;;  %v1943_v19 = vmov 1   ;;  %v1201_v32 = vld [vmem:[#allocation6 + $0x18] sm:$0xff] }
 0x46f   : > { %v1152_v41 = vmul.f32 %v1144_v34, %v2331_v58  ;;  %v1081_v35 = vsel %vm2456_vm2, %v2393_v54, %v1077_v40  ;;  %v1145_v51 = vmul.f32 %v1101_v44, %v2467_v37  ;;  %v1113_v58 = vmul.f32 %v1658_v26, %v2398_v57 }
 0x470   : > { %v1150_v53 = vmul.f32 %v1142_v43, %v2333_v62  ;;  %v1143_v62 = vmul.f32 %v1081_v35, %v2473_v50  ;;  %v1137_v54 = vmul.f32 %v2400_v59, %v1136_v45  ;;  %v1107_v60 = vmul.f32 %v1656_v11, %v1106_v55 }
 0x471   : > { %1170 = vrot.lane.b32.xlu1 %v1152_v41, %s1942_s27  ;;  %v1127_v49 = vmul.f32 %v2406_v63, %v1126_v52  ;;  %v1114_v61 = vmul.f32 %v1658_v26, %v1113_v58  ;;  %v1153_v2 = vmul.f32 %v1145_v51, %v2337_v3  ;;  %vm1202_vm14 = vcmask 15360  }
 0x472   : > { %1166 = vrot.lane.b32.xlu0 %v1150_v53, %s1942_s27  ;;  %v1111_v1 = vsel %vm1110_vm8, %v1656_v11, %v1107_v60  ;;  %v1151_v39 = vmul.f32 %v1143_v62, %v2341_v8  ;;  %v1141_v7 = vsel %vm2496_vm9, %v2400_v59, %v1137_v54  ;;  %v1051_v11 = vld [vmem:[#allocation15 + $0x28] sm:$0xff]  ;;  %1203 = vst.msk [vmem:[%s2633_s6] sm:$0xff] %vm1202_vm14, %v1198_v48  ;;  %vm1207_vm15 = vcmp.eq.s32.totalorder %v2152_v18, 0 }
 0x473   : > { %v1146_v4 = vmul.f32 %v1111_v1, %v2492_v56  ;;  %v1115_v5 = vmul.f32 0.5, %v1114_v61  ;;  %v1131_v57 = vsel %vm2501_vm10, %v2406_v63, %v1127_v49  ;;  %v1149_v8 = vmul.f32 %v1141_v7, %v2509_v6  ;;  %1204 = vst.msk [vmem:[%s2633_s6 + $0x8] sm:$0xff] %vm1202_vm14, %v1199_v27 }
 0x474   : > { %v1148_v59 = vmul.f32 %v1131_v57, %v2514_v9  ;;  %1205 = vst.msk [vmem:[%s2633_s6 + $0x10] sm:$0xff] %vm1202_vm14, %v1200_v47 }
 0x475   : > { %v1154_v3 = vmul.f32 %v1146_v4, %v2355_v28  ;;  %v1116_v10 = vsub.f32 1.5, %v1115_v5  ;;  %v1157_v63 = vmul.f32 %v1149_v8, %v2345_v15  ;;  %1206 = vst.msk [vmem:[%s2633_s6 + $0x18] sm:$0xff] %vm1202_vm14, %v1201_v32 }
 0x476   : > { %v1156_v28 = vmul.f32 %v1148_v59, %v2349_v22 }
 0x477   : > { %1174 = vrot.lane.b32.xlu2 %v1154_v3, %s1942_s27  ;;  %v1117_v12 = vmul.f32 %v1658_v26, %v1116_v10 }
 0x479   : > { %1172 = vrot.lane.b32.xlu1 %v1153_v2, %s1942_s27  ;;  %v1121_v13 = vsel %vm1120_vm13, %v1658_v26, %v1117_v12 }
 0x47a   : > { %1168 = vrot.lane.b32.xlu0 %v1151_v39, %s1942_s27  ;;  %v1147_v14 = vmul.f32 %v1121_v13, %v1051_v11 }
 0x47c   : > { %v1155_v16 = vmul.f32 %v1147_v14, %v2375_v42 }
 0x47f   : > { %1176 = vrot.lane.b32.xlu2 %v1155_v16, %s1942_s27 }
 0x481   : > { %1180 = vrot.lane.b32.xlu1 %v1157_v63, %s1942_s27 }
 0x482   : > { %1178 = vrot.lane.b32.xlu0 %v1156_v28, %s1942_s27 }
 0x487   : > { %1210 = vperm.xlu2 %1637, %v1142_v43  }
 0x489   : > { %1220 = vperm.xlu1 %1639, %v1144_v34  }
 0x48a   : > { %1215 = vperm.xlu0 %1638, %v1143_v62  }
 0x48f   : > { %1225 = vperm.xlu2 %1637, %v1145_v51  }
 0x491   : > { %1230 = vperm.xlu1 %1639, %v1146_v4  }
 0x492   : > { %1240 = vperm.xlu0 %1638, %v1148_v59  }
 0x497   : > { %1235 = vperm.xlu2 %1637, %v1147_v14  }
 0x499   : > { %1245 = vperm.xlu1 %1639, %v1149_v8  }
 0x49a   : > { %1641 = vset.pattern.permute.xlu0 %v1943_v19 }
 0x49f   : > { %1640 = vset.pattern.permute.xlu2 %v1943_v19 }
 0x4a1   : > { %1642 = vset.pattern.permute.xlu1 %v1943_v19 }
 0x4d1   : > { %v1175_v21 = vpop.permute.xlu2 %1174 }
 0x4d2   : > { %v1194_v36 = vsub.f32 %v2492_v56, %v1175_v21 }
 0x4e3   : > { %v1171_v15 = vpop.permute.xlu1 %1170 }
 0x4e4   : > { %v1192_v22 = vsub.f32 %v2427_v17, %v1171_v15  ;;  %v1167_v42 = vpop.permute.xlu0 %1166 }
 0x4e5   : > { %v1190_v20 = vsub.f32 %v2438_v25, %v1167_v42  ;;  %v1177_v25 = vpop.permute.xlu2 %1176 }
 0x4e6   : > { %1260 = vperm.xlu1 %1642, %v1192_v22   ;;  %v1195_v33 = vsub.f32 %v1051_v11, %v1177_v25 }
 0x4e7   : > { %1250 = vperm.xlu2 %1640, %v1190_v20  }
 0x4eb   : > { %v1173_v24 = vpop.permute.xlu1 %1172 }
 0x4ec   : > { %v1193_v29 = vsub.f32 %v2467_v37, %v1173_v24  ;;  %v1169_v23 = vpop.permute.xlu0 %1168 }
 0x4ed   : > { %v1191_v17 = vsub.f32 %v2473_v50, %v1169_v23  ;;  %v1211_v26 = vpop.permute.xlu2 %1210 }
 0x4ee   : > { %1270 = vperm.xlu1 %1642, %v1194_v36  }
 0x4ef   : > { %1265 = vperm.xlu2 %1640, %v1193_v29   ;;  %1255 = vperm.xlu0 %1641, %v1191_v17  }
 0x4f3   : > { %v1181_v31 = vpop.permute.xlu1 %1180 }
 0x4f4   : > { %v1197_v34 = vsub.f32 %v2509_v6, %v1181_v31  ;;  %v1179_v38 = vpop.permute.xlu0 %1178 }
 0x4f5   : > { %v1196_v40 = vsub.f32 %v2514_v9, %v1179_v38  ;;  %v1226_v43 = vpop.permute.xlu2 %1225 }
 0x4f6   : > { %1285 = vperm.xlu1 %1642, %v1197_v34  }
 0x4f7   : > { %1275 = vperm.xlu2 %1640, %v1195_v33   ;;  %1280 = vperm.xlu0 %1641, %v1196_v40  }
 0x4fb   : > { %v1221_v44 = vpop.permute.xlu1 %1220 }
 0x4fc   : > { %v1216_v52 = vpop.permute.xlu0 %1215 }
 0x4fd   : > { %v1236_v37 = vpop.permute.xlu2 %1235 }
 0x503   : > { %v1231_v41 = vpop.permute.xlu1 %1230 }
 0x504   : > { %v1241_v62 = vpop.permute.xlu0 %1240 }
 0x50b   : > { %v1246_v53 = vpop.permute.xlu1 %1245 }
 0x541   : > { %v1251_v45 = vpop.permute.xlu2 %1250 }
 0x542   : > { %v1288_v46 = vsel %vm1207_vm15, %v1211_v26, %v1251_v45 }
 0x543   : > { %1296 = vst.msk [vmem:[%s2634_s7] sm:$0xff] %vm1202_vm14, %v1288_v46 }
 0x549   : > { %v1266_v50 = vpop.permute.xlu2 %1265 }
 0x54a   : > { %v1291_v35 = vsel %vm1207_vm15, %v1226_v43, %v1266_v50 }
 0x54b   : > { %1299 = vst.msk [vmem:[%s2634_s7 + $0x18] sm:$0xff] %vm1202_vm14, %v1291_v35 }
 0x551   : > { %v1276_v55 = vpop.permute.xlu2 %1275 }
 0x552   : > { %v1293_v51 = vsel %vm1207_vm15, %v1236_v37, %v1276_v55 }
 0x553   : > { %1301 = vst.msk [vmem:[%s2634_s7 + $0x28] sm:$0xff] %vm1202_vm14, %v1293_v51 }
 0x558   : > { %v1261_v58 = vpop.permute.xlu1 %1260 }
 0x559   : > { %v1290_v54 = vsel %vm1207_vm15, %v1221_v44, %v1261_v58 }
 0x55a   : > { %1298 = vst.msk [vmem:[%s2634_s7 + $0x10] sm:$0xff] %vm1202_vm14, %v1290_v54 }
 0x560   : > { %v1271_v56 = vpop.permute.xlu1 %1270 }
 0x561   : > { %v1292_v60 = vsel %vm1207_vm15, %v1231_v41, %v1271_v56  ;;  %v1256_v30 = vpop.permute.xlu0 %1255 }
 0x562   : > { %1300 = vst.msk [vmem:[%s2634_s7 + $0x20] sm:$0xff] %vm1202_vm14, %v1292_v60  ;;  %v1289_v49 = vsel %vm1207_vm15, %v1216_v52, %v1256_v30 }
 0x563   : > { %1297 = vst.msk [vmem:[%s2634_s7 + $0x8] sm:$0xff] %vm1202_vm14, %v1289_v49 }
 0x568   : > { %v1286_v61 = vpop.permute.xlu1 %1285 }
 0x569   : > { %v1295_v0 = vsel %vm1207_vm15, %v1246_v53, %v1286_v61  ;;  %v1281_v1 = vpop.permute.xlu0 %1280 }
 0x56a   : > { %1303 = vst.msk [vmem:[%s2634_s7 + $0x38] sm:$0xff] %vm1202_vm14, %v1295_v0  ;;  %v1294_v2 = vsel %vm1207_vm15, %v1241_v62, %v1281_v1 }
 0x56b   : > { %1302 = vst.msk [vmem:[%s2634_s7 + $0x30] sm:$0xff] %vm1202_vm14, %v1294_v2 }
 0x56c PF: > { %s26_s8 = sadd.s32 1, %s1921_s8   ;;  %s2675_s17 = sld [smem:[#allocation25_spill]] }
 0x56d   : > { %p23_p11 = scmp.ge.s32.totalorder %s26_s8, 6   ;;  %s2676_s28 = sld [smem:[#allocation22_spill]] }
 0x56e   : > { %s2677_s21 = sld [smem:[#allocation23_spill]]  ;;  %s2679_s24 = smov %s1897_s25 }
 0x56f   : > { %s2678_s30 = sld [smem:[#allocation24_spill]]  ;;  %s2680_s25 = smov %s1901_s26 }
 0x570   : > { %s2682_s27 = smov %s1913_s29  ;;  %25 = sbr.rel (!%p23_p11) target bundleno = 14 (0xe), region = 137 }
 0x572   : > { %s2681_s26 = smov %s2675_s17 }
 0x574   : > { %s2683_s29 = smov %s2677_s21 }
 0x575   :  { %1321 = vsyncpa [#allocation8], 1 }
 0x576   :  { %1323 = vsyncpa [#allocation8 + $0x1], 1 }
 0x577   :  { %1324 = vsyncpa [#allocation10], 1 }
 0x578   :  { %1326 = vsyncpa [#allocation10 + $0x1], 1 }
 0x579   :  { %1327 = vsyncpa [#allocation13], 1 }
 0x57a   :  { %1328 = vsyncpa [#allocation16], 1 }

</bundles_post_ra>
